<compile_context>
chip_gen: v7x
topology: tpu7x:2x2x1
jax: 0.10.0
libtpu: 0.0.40
codegen_flags: <defaults>
</compile_context>

<pallas_src>
import math
import numpy as np
import jax
import jax.numpy as jnp
from jax.experimental import pallas as pl
from jax.experimental.pallas import tpu as pltpu

# ---------------- problem sizes (small, consistent with the module) ----------
B = 2          # batch
T = 8          # decoder sequence length (targets.size(1))
H = 32         # hiddim   (whisper decoder hidden size)
A = 16         # attndim
E = 32         # embdim == treehid (GNNdim == 0)
L = 6          # maxlen of per-step biasing list (incl. trailing ooKB slot)
V = 48         # nvocab ; ooKB_id == V, so distributions have V + 1 entries
SOTLEN = 2
TEFF = T - SOTLEN      # time steps entering the loss: slice [sotlen-1 : -1]
N = B * T              # fused row count for the TCPGen math
NEFF = B * TEFF        # fused row count for pointer mixing / loss

assert H == E, "packed-matmul layout assumes hid and KB features share width"

XROWS = N + L * N          # 112 rows: 0:16 hidden, 16:112 KB embs (slot-major)
XCOLS = H + 1              # 33 cols : 32 features + ones column (drives biases)
PWCOLS = 2 * A + 1 + A     # 49 cols : Wq | Wk | Wg_hid | wg_row(bias row only)
SIDEC = 2 * L + 1          # 13 cols : index_list | step_mask | target


# =============================================================================
# Single fused kernel: whole TCPGen head + pointer mixing + NLL loss.
# =============================================================================
def _fused_kernel(x_ref, pw_ref, side_ref, logit_ref, pf_ref, loss_ref):
    # ---- ONE packed MXU pass -----------------------------------------------
    #   xw[0:N,   0:A ]  = hid @ Wq + bq
    #   xw[N:,    A:2A]  = kb  @ Wk + bk          (rows are slot-major l*N + n)
    #   xw[0:N,   2A  ]  = hid @ Wg[A:] + bg
    #   xw[:, 2A+1:2A+1+A] = Wg[:A] broadcast to every row (ones col x bias row)
    xw = jnp.dot(x_ref[...], pw_ref[...],
                 preferred_element_type=jnp.float32)                 # [112, 49]

    q = xw[0:N, 0:A]                                                 # [N, A]
    ghid = xw[0:N, 2 * A:2 * A + 1]                                  # [N, 1]
    wg_row = xw[0:N, 2 * A + 1:2 * A + 1 + A]                        # [N, A]

    side = side_ref[...]                                             # [N,13] i32

    # ---- masked KB attention, unrolled over the L slots: pure 2-D VPU/XLU
    #      ops on tile-aligned slices, no [N, L, A] reshape relayouts ---------
    inv_sqrt_a = 1.0 / math.sqrt(A)
    kbp, sc = [], []
    for l in range(L):
        k_l = xw[N + l * N:N + (l + 1) * N, A:2 * A]                 # [N, A]
        s_l = jnp.sum(k_l * q, axis=-1, keepdims=True) * inv_sqrt_a  # [N, 1]
        s_l = jnp.where(side[:, L + l:L + l + 1] > 0, -1e9, s_l)     # step_mask
        kbp.append(k_l)
        sc.append(s_l)

    m = sc[0]
    for l in range(1, L):
        m = jnp.maximum(m, sc[l])
    ex = [jnp.exp(s - m) for s in sc]
    den = ex[0]
    for l in range(1, L):
        den = den + ex[l]
    inv_den = pl.reciprocal(den, approx=True)                        # EUP slot
    w = [e * inv_den for e in ex]                                    # L x [N,1]

    # KB embedding hptr excludes the trailing ooKB slot (l == L-1)
    hptr = w[0] * kbp[0]
    for l in range(1, L - 1):
        hptr = hptr + w[l] * kbp[l]                                  # [N, A]

    # pointer gate: sigmoid(hptr . Wg[:A] + hid . Wg[A:] + bg)
    gate = jax.nn.sigmoid(
        jnp.sum(hptr * wg_row, axis=-1, keepdims=True) + ghid)       # [N, 1]

    # scatter attention weights to the vocab via index compares
    # (replaces the one-hot back_transform input; duplicates sum, as scatter_
    #  of ones followed by the einsum does in the module)
    vocab2 = jax.lax.broadcasted_iota(jnp.int32, (N, V), 1)
    dist_v = jnp.zeros((N, V), jnp.float32)
    dist_oo = jnp.zeros((N, 1), jnp.float32)
    for l in range(L):
        idx_l = side[:, l:l + 1]                                     # [N,1] i32
        dist_v = dist_v + jnp.where(vocab2 == idx_l, w[l], 0.0)
        dist_oo = dist_oo + jnp.where(idx_l == V, w[l], 0.0)         # ooKB col

    # ---- pointer mixing + NLL loss, all kept in [B, TEFF, .] 3-D shapes -----
    lg = logit_ref[:, SOTLEN - 1:T - 1, :]                           # [B,TEFF,V]
    lg = lg - jnp.max(lg, axis=-1, keepdims=True)
    exl = jnp.exp(lg)
    md = exl * pl.reciprocal(jnp.sum(exl, axis=-1, keepdims=True),
                             approx=True)                            # model_dist

    tgt3 = side[:, 2 * L:2 * L + 1].reshape(B, T, 1)                 # [B, T, 1]
    pg = gate.reshape(B, T, 1)[:, SOTLEN - 1:T - 1, :]               # [B,TEFF,1]
    pg = jnp.where(tgt3[:, SOTLEN - 1:T - 1, :] <= 0, 0.0, pg)       # p_gen_mask

    dv = dist_v.reshape(B, T, V)[:, SOTLEN - 1:T - 1, :]             # [B,TEFF,V]
    do = dist_oo.reshape(B, T, 1)[:, SOTLEN - 1:T - 1, :]            # [B,TEFF,1]
    p_final = dv * pg + md * (1.0 - pg + do * pg)                    # [B,TEFF,V]
    pf_ref[...] = p_final

    # NLL loss (ignore_index=-100, reduction='none') via iota one-hot "gather"
    # (no negative-index wrap).  Denominator counts (per != 0) to match the
    # module's p_loss.sum() / (p_loss != 0).sum().
    ttgt = tgt3[:, SOTLEN:T, :]                                      # [B,TEFF,1]
    vocab3 = jax.lax.broadcasted_iota(jnp.int32, (B, TEFF, V), 2)
    onehot = (vocab3 == ttgt).astype(jnp.float32)                    # 0 for -100
    per = -jnp.sum(jnp.log(p_final + 1e-9) * onehot, axis=-1, keepdims=True)
    per = jnp.where(ttgt == -100, 0.0, per)
    denom = jnp.maximum(jnp.sum((per != 0.0).astype(jnp.float32)), 1.0)
    loss_ref[...] = (jnp.sum(per) / denom).reshape(1, 1)


def whisper_biasing_forward(logits, hidden, targets, kb_emb, step_mask,
                            index_list, params):
    Wq, bq, Wk, bk, Wg, bg = params

    # ---- host-side packing: a handful of tiny one-time XLA ops that collapse
    #      12 tiny kernel inputs down to 4 and enable the single MXU pass -----
    hid2 = hidden.reshape(N, H)
    # slot-major KB rows so per-slot in-kernel slices are tile-aligned 2-D
    kb_sm = jnp.transpose(kb_emb, (2, 0, 1, 3)).reshape(L * N, E)
    feats = jnp.concatenate([hid2, kb_sm], axis=0)                      # [112,32]
    x_aug = jnp.concatenate(
        [feats, jnp.ones((XROWS, 1), jnp.float32)], axis=1)             # [112,33]

    # packed parameter buffer [33, 49]: weights stacked column-wise; the last
    # row carries (bq | bk | bg | Wg[:A]) so the ones column of x_aug both adds
    # the biases and broadcasts Wg[:A] to every output row.
    w_block = jnp.concatenate(
        [Wq, Wk, Wg[A:, :], jnp.zeros((H, A), jnp.float32)], axis=1)    # [32,49]
    b_row = jnp.concatenate([bq, bk, bg, Wg[:A, :].T], axis=1)          # [1, 49]
    pw = jnp.concatenate([w_block, b_row], axis=0)                      # [33,49]

    # int32 side buffer: index_list | step_mask | targets, row = b*T + t
    side = jnp.concatenate([
        index_list.reshape(N, L).astype(jnp.int32),
        step_mask.reshape(N, L).astype(jnp.int32),
        targets.reshape(N, 1).astype(jnp.int32)], axis=1)               # [16,13]

    pf3, loss = pl.pallas_call(
        _fused_kernel,
        out_shape=(
            jax.ShapeDtypeStruct((B, TEFF, V), jnp.float32),
            jax.ShapeDtypeStruct((1, 1), jnp.float32),
        ),
        grid_spec=pltpu.PrefetchScalarGridSpec(
            num_scalar_prefetch=0,
            grid=(1,),                                  # single fused block
            in_specs=[
                pl.BlockSpec((XROWS, XCOLS), lambda i: (0, 0)),
                pl.BlockSpec((XCOLS, PWCOLS), lambda i: (0, 0)),
                pl.BlockSpec((N, SIDEC), lambda i: (0, 0)),
                pl.BlockSpec((B, T, V), lambda i: (0, 0, 0)),
            ],
            out_specs=[
                pl.BlockSpec((B, TEFF, V), lambda i: (0, 0, 0)),
                pl.BlockSpec((1, 1), lambda i: (0, 0)),
            ],
        ),
        compiler_params=pltpu.CompilerParams(
            dimension_semantics=("arbitrary",)),
    )(x_aug, pw, side, logits)

    return loss[0, 0], pf3.reshape(NEFF, V)   # free leading-dim flatten


# Pure-JAX reference (mirrors the PyTorch math) for a sanity check.
def reference_forward(logits, hidden, targets,
                      kb_emb, step_mask, back_transform, params):
    Wq, bq, Wk, bk, Wg, bg = params
    query = hidden @ Wq + bq                                             # [B,T,A]
    kbp = kb_emb @ Wk + bk                                               # [B,T,L,A]
    scores = jnp.einsum('btla,bta->btl', kbp, query) / math.sqrt(A)
    scores = jnp.where(step_mask > 0.5, -1e9, scores)
    w = jax.nn.softmax(scores, axis=-1)
    hptr = jnp.einsum('btla,btl->bta', kbp[:, :, :-1], w[:, :, :-1])
    dist = jnp.einsum('btlv,btl->btv', back_transform, w)
    gate = jax.nn.sigmoid(jnp.concatenate([hptr, hidden], -1) @ Wg + bg)

    md = jax.nn.softmax(logits[:, SOTLEN - 1:-1], axis=-1)
    pg = gate[:, SOTLEN - 1:-1, 0]
    pm = (targets <= 0).astype(jnp.float32)[:, SOTLEN - 1:-1]
    pg = jnp.where(pm > 0.5, 0.0, pg)
    ds = dist[:, SOTLEN - 1:-1]
    comp = ds[:, :, -1] * pg
    pf = ds[:, :, :-1] * pg[..., None] + md * (1 - pg + comp)[..., None]
    pf = pf.reshape(-1, V)

    tflat = targets[:, SOTLEN:].reshape(-1)
    safe = jnp.where(tflat == -100, 0, tflat)
    per = -jnp.take_along_axis(jnp.log(pf + 1e-9), safe[:, None], axis=1)[:, 0]
    per = jnp.where(tflat == -100, 0.0, per)
    loss = per.sum() / jnp.maximum((per != 0).sum(), 1)
    return loss, pf


if __name__ == "__main__":
    key = jax.random.PRNGKey(0)
    keys = jax.random.split(key, 12)

    # ---- parameters (LeCun-normal init; biases zero; float32) ----
    Wq = jax.random.normal(keys[0], (H, A), jnp.float32) / math.sqrt(H)
    bq = jnp.zeros((1, A), jnp.float32)
    Wk = jax.random.normal(keys[1], (E, A), jnp.float32) / math.sqrt(E)
    bk = jnp.zeros((1, A), jnp.float32)
    Wg = jax.random.normal(keys[2], (A + H, 1), jnp.float32) / math.sqrt(A + H)
    bg = jnp.zeros((1, 1), jnp.float32)
    ooKB_w = jax.random.normal(keys[3], (1, E), jnp.float32) / math.sqrt(E)
    tok_emb = jax.random.normal(keys[4], (V, E), jnp.float32) / math.sqrt(E)
    params = (Wq, bq, Wk, bk, Wg, bg)

    # ---- inputs ----
    fbank = jax.random.normal(keys[5], (B, 4, 16), jnp.float32)
    targets = jax.random.randint(keys[6], (B, T), 1, V, jnp.int32)
    targets = targets.at[0, 3].set(0)          # exercise p_gen_mask
    targetmask = jnp.ones((B, T), jnp.int32)

    # ---- stub of whisper.getstates (deterministic tiny network) ----
    # TODO(synk): real Whisper encoder/decoder is external; stubbed here.
    W_hid = jax.random.normal(keys[7], (E, H), jnp.float32) / math.sqrt(E)
    W_out = jax.random.normal(keys[8], (H, V), jnp.float32) / math.sqrt(H)
    emb_in = tok_emb[targets * targetmask]                               # [B,T,E]
    fb = jnp.mean(fbank, axis=(1, 2))                                    # [B]
    hidden = jnp.tanh(emb_in @ W_hid + 0.1 * fb[:, None, None])          # [B,T,H]
    logits = hidden @ W_out                                              # [B,T,V]

    # ---- synthetic outputs of get_step_biasing_embs_prefix ----
    # TODO(synk): prefix-tree walking is host-side Python control flow; its
    # tensor outputs are synthesized deterministically here.
    n_valid = 1 + (jnp.arange(T)[None, :] + jnp.arange(B)[:, None]) % (L - 1)
    rand_idx = jax.random.randint(keys[9], (B, T, L), 0, V, jnp.int32)
    slot = jnp.arange(L)[None, None, :]
    index_list = jnp.where(slot < n_valid[:, :, None], rand_idx, V)      # pad ooKB
    step_mask = jnp.where((slot >= n_valid[:, :, None]) & (slot < L - 1),
                          1.0, 0.0).astype(jnp.float32)                  # [B,T,L]
    back_transform = jax.nn.one_hot(index_list, V + 1, dtype=jnp.float32)
    full_emb = jnp.concatenate([tok_emb, ooKB_w], axis=0)                # [V+1,E]
    kb_emb = full_emb[index_list]                                        # [B,T,L,E]

    # ---- run the fused kernel (back_transform no longer needed: kernel takes
    #      index_list and builds the one-hot scatter in-register) ----
    loss, p_final = whisper_biasing_forward(
        logits, hidden, targets, kb_emb, step_mask, index_list, params)
    jax.block_until_ready((loss, p_final))

    # ---- sanity check vs plain-JAX reference ----
    loss_ref, pf_ref = reference_forward(
        logits, hidden, targets, kb_emb, step_mask, back_transform, params)
    np.testing.assert_allclose(np.asarray(p_final), np.asarray(pf_ref),
                               atol=5e-2, rtol=5e-2)
    np.testing.assert_allclose(np.asarray(loss), np.asarray(loss_ref),
                               atol=5e-2, rtol=5e-2)

    print("KERNEL_OK")
</pallas_src>

<mosaic_0001>
module attributes {stable_mosaic.version = 11 : i64} {
  func.func @_fused_kernel(%arg0: i32, %arg1: memref<112x33xf32, #tpu.memory_space<vmem>>, %arg2: memref<33x49xf32, #tpu.memory_space<vmem>>, %arg3: memref<16x13xi32, #tpu.memory_space<vmem>>, %arg4: memref<2x8x48xf32, #tpu.memory_space<vmem>>, %arg5: memref<2x6x48xf32, #tpu.memory_space<vmem>>, %arg6: memref<1x1xf32, #tpu.memory_space<vmem>>) attributes {dimension_semantics = [#tpu.dimension_semantics<arbitrary>], iteration_bounds = array<i64: 1>, scalar_prefetch = 0 : i64, scratch_operands = 0 : i64, tpu.core_type = #tpu.core_type<tc>, window_params = [{pipeline_mode = #tpu.pipeline_mode<synchronous>, transform_indices = @transform_0, window_bounds = array<i64: 112, 33>}, {pipeline_mode = #tpu.pipeline_mode<synchronous>, transform_indices = @transform_1, window_bounds = array<i64: 33, 49>}, {pipeline_mode = #tpu.pipeline_mode<synchronous>, transform_indices = @transform_2, window_bounds = array<i64: 16, 13>}, {pipeline_mode = #tpu.pipeline_mode<synchronous>, transform_indices = @transform_3, window_bounds = array<i64: 2, 8, 48>}, {pipeline_mode = #tpu.pipeline_mode<synchronous>, transform_indices = @transform_4, window_bounds = array<i64: 2, 6, 48>}, {pipeline_mode = #tpu.pipeline_mode<synchronous>, transform_indices = @transform_5, window_bounds = array<i64: 1, 1>}]} {
    %c0 = arith.constant 0 : index
    %c0_0 = arith.constant 0 : index
    %0 = vector.load %arg1[%c0, %c0_0] : memref<112x33xf32, #tpu.memory_space<vmem>>, vector<112x33xf32>
    %c0_1 = arith.constant 0 : index
    %c0_2 = arith.constant 0 : index
    %1 = vector.load %arg2[%c0_1, %c0_2] : memref<33x49xf32, #tpu.memory_space<vmem>>, vector<33x49xf32>
    %cst = arith.constant dense<0.000000e+00> : vector<112x49xf32>
    %2 = tpu.matmul %0, %1, %cst {dimension_numbers = #tpu.dot_dimension_numbers<[1], [0], [0], [1], [0, 0, 1, 1], [], []>} : vector<112x33xf32>, vector<33x49xf32>, vector<112x49xf32> -> vector<112x49xf32>
    %3 = vector.extract_strided_slice %2 {offsets = [0, 0], sizes = [16, 16], strides = [1, 1]} : vector<112x49xf32> to vector<16x16xf32>
    %4 = vector.extract_strided_slice %2 {offsets = [0, 32], sizes = [16, 1], strides = [1, 1]} : vector<112x49xf32> to vector<16x1xf32>
    %5 = vector.extract_strided_slice %2 {offsets = [0, 33], sizes = [16, 16], strides = [1, 1]} : vector<112x49xf32> to vector<16x16xf32>
    %c0_3 = arith.constant 0 : index
    %c0_4 = arith.constant 0 : index
    %6 = vector.load %arg3[%c0_3, %c0_4] : memref<16x13xi32, #tpu.memory_space<vmem>>, vector<16x13xi32>
    %7 = vector.extract_strided_slice %2 {offsets = [16, 16], sizes = [16, 16], strides = [1, 1]} : vector<112x49xf32> to vector<16x16xf32>
    %8 = arith.mulf %7, %3 : vector<16x16xf32>
    %cst_5 = arith.constant dense<0.000000e+00> : vector<16xf32>
    %9 = vector.multi_reduction <add>, %8, %cst_5 [1] : vector<16x16xf32> to vector<16xf32>
    %10 = vector.shape_cast %9 : vector<16xf32> to vector<16x1xf32>
    %cst_6 = arith.constant 2.500000e-01 : f32
    %11 = vector.broadcast %cst_6 : f32 to vector<16x1xf32>
    %12 = arith.mulf %10, %11 : vector<16x1xf32>
    %13 = vector.extract_strided_slice %6 {offsets = [0, 6], sizes = [16, 1], strides = [1, 1]} : vector<16x13xi32> to vector<16x1xi32>
    %c0_i32 = arith.constant 0 : i32
    %14 = vector.broadcast %c0_i32 : i32 to vector<16x1xi32>
    %15 = arith.cmpi sgt, %13, %14 : vector<16x1xi32>
    %cst_7 = arith.constant -1.000000e+09 : f32
    %16 = vector.broadcast %cst_7 : f32 to vector<16x1xf32>
    %17 = arith.select %15, %16, %12 : vector<16x1xi1>, vector<16x1xf32>
    %18 = vector.extract_strided_slice %2 {offsets = [32, 16], sizes = [16, 16], strides = [1, 1]} : vector<112x49xf32> to vector<16x16xf32>
    %19 = arith.mulf %18, %3 : vector<16x16xf32>
    %cst_8 = arith.constant dense<0.000000e+00> : vector<16xf32>
    %20 = vector.multi_reduction <add>, %19, %cst_8 [1] : vector<16x16xf32> to vector<16xf32>
    %21 = vector.shape_cast %20 : vector<16xf32> to vector<16x1xf32>
    %cst_9 = arith.constant 2.500000e-01 : f32
    %22 = vector.broadcast %cst_9 : f32 to vector<16x1xf32>
    %23 = arith.mulf %21, %22 : vector<16x1xf32>
    %24 = vector.extract_strided_slice %6 {offsets = [0, 7], sizes = [16, 1], strides = [1, 1]} : vector<16x13xi32> to vector<16x1xi32>
    %c0_i32_10 = arith.constant 0 : i32
    %25 = vector.broadcast %c0_i32_10 : i32 to vector<16x1xi32>
    %26 = arith.cmpi sgt, %24, %25 : vector<16x1xi32>
    %cst_11 = arith.constant -1.000000e+09 : f32
    %27 = vector.broadcast %cst_11 : f32 to vector<16x1xf32>
    %28 = arith.select %26, %27, %23 : vector<16x1xi1>, vector<16x1xf32>
    %29 = vector.extract_strided_slice %2 {offsets = [48, 16], sizes = [16, 16], strides = [1, 1]} : vector<112x49xf32> to vector<16x16xf32>
    %30 = arith.mulf %29, %3 : vector<16x16xf32>
    %cst_12 = arith.constant dense<0.000000e+00> : vector<16xf32>
    %31 = vector.multi_reduction <add>, %30, %cst_12 [1] : vector<16x16xf32> to vector<16xf32>
    %32 = vector.shape_cast %31 : vector<16xf32> to vector<16x1xf32>
    %cst_13 = arith.constant 2.500000e-01 : f32
    %33 = vector.broadcast %cst_13 : f32 to vector<16x1xf32>
    %34 = arith.mulf %32, %33 : vector<16x1xf32>
    %35 = vector.extract_strided_slice %6 {offsets = [0, 8], sizes = [16, 1], strides = [1, 1]} : vector<16x13xi32> to vector<16x1xi32>
    %c0_i32_14 = arith.constant 0 : i32
    %36 = vector.broadcast %c0_i32_14 : i32 to vector<16x1xi32>
    %37 = arith.cmpi sgt, %35, %36 : vector<16x1xi32>
    %cst_15 = arith.constant -1.000000e+09 : f32
    %38 = vector.broadcast %cst_15 : f32 to vector<16x1xf32>
    %39 = arith.select %37, %38, %34 : vector<16x1xi1>, vector<16x1xf32>
    %40 = vector.extract_strided_slice %2 {offsets = [64, 16], sizes = [16, 16], strides = [1, 1]} : vector<112x49xf32> to vector<16x16xf32>
    %41 = arith.mulf %40, %3 : vector<16x16xf32>
    %cst_16 = arith.constant dense<0.000000e+00> : vector<16xf32>
    %42 = vector.multi_reduction <add>, %41, %cst_16 [1] : vector<16x16xf32> to vector<16xf32>
    %43 = vector.shape_cast %42 : vector<16xf32> to vector<16x1xf32>
    %cst_17 = arith.constant 2.500000e-01 : f32
    %44 = vector.broadcast %cst_17 : f32 to vector<16x1xf32>
    %45 = arith.mulf %43, %44 : vector<16x1xf32>
    %46 = vector.extract_strided_slice %6 {offsets = [0, 9], sizes = [16, 1], strides = [1, 1]} : vector<16x13xi32> to vector<16x1xi32>
    %c0_i32_18 = arith.constant 0 : i32
    %47 = vector.broadcast %c0_i32_18 : i32 to vector<16x1xi32>
    %48 = arith.cmpi sgt, %46, %47 : vector<16x1xi32>
    %cst_19 = arith.constant -1.000000e+09 : f32
    %49 = vector.broadcast %cst_19 : f32 to vector<16x1xf32>
    %50 = arith.select %48, %49, %45 : vector<16x1xi1>, vector<16x1xf32>
    %51 = vector.extract_strided_slice %2 {offsets = [80, 16], sizes = [16, 16], strides = [1, 1]} : vector<112x49xf32> to vector<16x16xf32>
    %52 = arith.mulf %51, %3 : vector<16x16xf32>
    %cst_20 = arith.constant dense<0.000000e+00> : vector<16xf32>
    %53 = vector.multi_reduction <add>, %52, %cst_20 [1] : vector<16x16xf32> to vector<16xf32>
    %54 = vector.shape_cast %53 : vector<16xf32> to vector<16x1xf32>
    %cst_21 = arith.constant 2.500000e-01 : f32
    %55 = vector.broadcast %cst_21 : f32 to vector<16x1xf32>
    %56 = arith.mulf %54, %55 : vector<16x1xf32>
    %57 = vector.extract_strided_slice %6 {offsets = [0, 10], sizes = [16, 1], strides = [1, 1]} : vector<16x13xi32> to vector<16x1xi32>
    %c0_i32_22 = arith.constant 0 : i32
    %58 = vector.broadcast %c0_i32_22 : i32 to vector<16x1xi32>
    %59 = arith.cmpi sgt, %57, %58 : vector<16x1xi32>
    %cst_23 = arith.constant -1.000000e+09 : f32
    %60 = vector.broadcast %cst_23 : f32 to vector<16x1xf32>
    %61 = arith.select %59, %60, %56 : vector<16x1xi1>, vector<16x1xf32>
    %62 = vector.extract_strided_slice %2 {offsets = [96, 16], sizes = [16, 16], strides = [1, 1]} : vector<112x49xf32> to vector<16x16xf32>
    %63 = arith.mulf %62, %3 : vector<16x16xf32>
    %cst_24 = arith.constant dense<0.000000e+00> : vector<16xf32>
    %64 = vector.multi_reduction <add>, %63, %cst_24 [1] : vector<16x16xf32> to vector<16xf32>
    %65 = vector.shape_cast %64 : vector<16xf32> to vector<16x1xf32>
    %cst_25 = arith.constant 2.500000e-01 : f32
    %66 = vector.broadcast %cst_25 : f32 to vector<16x1xf32>
    %67 = arith.mulf %65, %66 : vector<16x1xf32>
    %68 = vector.extract_strided_slice %6 {offsets = [0, 11], sizes = [16, 1], strides = [1, 1]} : vector<16x13xi32> to vector<16x1xi32>
    %c0_i32_26 = arith.constant 0 : i32
    %69 = vector.broadcast %c0_i32_26 : i32 to vector<16x1xi32>
    %70 = arith.cmpi sgt, %68, %69 : vector<16x1xi32>
    %cst_27 = arith.constant -1.000000e+09 : f32
    %71 = vector.broadcast %cst_27 : f32 to vector<16x1xf32>
    %72 = arith.select %70, %71, %67 : vector<16x1xi1>, vector<16x1xf32>
    %73 = arith.maximumf %17, %28 : vector<16x1xf32>
    %74 = arith.maximumf %73, %39 : vector<16x1xf32>
    %75 = arith.maximumf %74, %50 : vector<16x1xf32>
    %76 = arith.maximumf %75, %61 : vector<16x1xf32>
    %77 = arith.maximumf %76, %72 : vector<16x1xf32>
    %78 = arith.subf %17, %77 : vector<16x1xf32>
    %79 = math.exp %78 : vector<16x1xf32>
    %80 = arith.subf %28, %77 : vector<16x1xf32>
    %81 = math.exp %80 : vector<16x1xf32>
    %82 = arith.subf %39, %77 : vector<16x1xf32>
    %83 = math.exp %82 : vector<16x1xf32>
    %84 = arith.subf %50, %77 : vector<16x1xf32>
    %85 = math.exp %84 : vector<16x1xf32>
    %86 = arith.subf %61, %77 : vector<16x1xf32>
    %87 = math.exp %86 : vector<16x1xf32>
    %88 = arith.subf %72, %77 : vector<16x1xf32>
    %89 = math.exp %88 : vector<16x1xf32>
    %90 = arith.addf %79, %81 : vector<16x1xf32>
    %91 = arith.addf %90, %83 : vector<16x1xf32>
    %92 = arith.addf %91, %85 : vector<16x1xf32>
    %93 = arith.addf %92, %87 : vector<16x1xf32>
    %94 = arith.addf %93, %89 : vector<16x1xf32>
    %95 = tpu.reciprocal %94 {approx = true} : vector<16x1xf32> -> vector<16x1xf32>
    %96 = arith.mulf %79, %95 : vector<16x1xf32>
    %97 = arith.mulf %81, %95 : vector<16x1xf32>
    %98 = arith.mulf %83, %95 : vector<16x1xf32>
    %99 = arith.mulf %85, %95 : vector<16x1xf32>
    %100 = arith.mulf %87, %95 : vector<16x1xf32>
    %101 = arith.mulf %89, %95 : vector<16x1xf32>
    %102 = vector.broadcast %96 : vector<16x1xf32> to vector<16x16xf32>
    %103 = arith.mulf %102, %7 : vector<16x16xf32>
    %104 = vector.broadcast %97 : vector<16x1xf32> to vector<16x16xf32>
    %105 = arith.mulf %104, %18 : vector<16x16xf32>
    %106 = arith.addf %103, %105 : vector<16x16xf32>
    %107 = vector.broadcast %98 : vector<16x1xf32> to vector<16x16xf32>
    %108 = arith.mulf %107, %29 : vector<16x16xf32>
    %109 = arith.addf %106, %108 : vector<16x16xf32>
    %110 = vector.broadcast %99 : vector<16x1xf32> to vector<16x16xf32>
    %111 = arith.mulf %110, %40 : vector<16x16xf32>
    %112 = arith.addf %109, %111 : vector<16x16xf32>
    %113 = vector.broadcast %100 : vector<16x1xf32> to vector<16x16xf32>
    %114 = arith.mulf %113, %51 : vector<16x16xf32>
    %115 = arith.addf %112, %114 : vector<16x16xf32>
    %116 = arith.mulf %115, %5 : vector<16x16xf32>
    %cst_28 = arith.constant dense<0.000000e+00> : vector<16xf32>
    %117 = vector.multi_reduction <add>, %116, %cst_28 [1] : vector<16x16xf32> to vector<16xf32>
    %118 = vector.shape_cast %117 : vector<16xf32> to vector<16x1xf32>
    %119 = arith.addf %118, %4 : vector<16x1xf32>
    %120 = arith.negf %119 : vector<16x1xf32>
    %121 = math.exp %120 : vector<16x1xf32>
    %cst_29 = arith.constant 1.000000e+00 : f32
    %122 = vector.broadcast %cst_29 : f32 to vector<16x1xf32>
    %123 = arith.addf %122, %121 : vector<16x1xf32>
    %124 = arith.divf %122, %123 : vector<16x1xf32>
    %125 = tpu.iota {dimensions = array<i32: 1>} : vector<16x48xi32>
    %cst_30 = arith.constant 0.000000e+00 : f32
    %126 = vector.broadcast %cst_30 : f32 to vector<16x48xf32>
    %cst_31 = arith.constant 0.000000e+00 : f32
    %127 = vector.broadcast %cst_31 : f32 to vector<16x1xf32>
    %128 = vector.extract_strided_slice %6 {offsets = [0, 0], sizes = [16, 1], strides = [1, 1]} : vector<16x13xi32> to vector<16x1xi32>
    %129 = vector.broadcast %128 : vector<16x1xi32> to vector<16x48xi32>
    %130 = arith.cmpi eq, %125, %129 : vector<16x48xi32>
    %cst_32 = arith.constant 0.000000e+00 : f32
    %131 = vector.shape_cast %96 : vector<16x1xf32> to vector<16x1xf32>
    %132 = vector.broadcast %131 : vector<16x1xf32> to vector<16x48xf32>
    %133 = vector.broadcast %cst_32 : f32 to vector<16x48xf32>
    %134 = arith.select %130, %132, %133 : vector<16x48xi1>, vector<16x48xf32>
    %135 = arith.addf %126, %134 : vector<16x48xf32>
    %c48_i32 = arith.constant 48 : i32
    %136 = vector.broadcast %c48_i32 : i32 to vector<16x1xi32>
    %137 = arith.cmpi eq, %128, %136 : vector<16x1xi32>
    %cst_33 = arith.constant 0.000000e+00 : f32
    %138 = vector.broadcast %cst_33 : f32 to vector<16x1xf32>
    %139 = arith.select %137, %96, %138 : vector<16x1xi1>, vector<16x1xf32>
    %140 = arith.addf %127, %139 : vector<16x1xf32>
    %141 = vector.extract_strided_slice %6 {offsets = [0, 1], sizes = [16, 1], strides = [1, 1]} : vector<16x13xi32> to vector<16x1xi32>
    %142 = vector.broadcast %141 : vector<16x1xi32> to vector<16x48xi32>
    %143 = arith.cmpi eq, %125, %142 : vector<16x48xi32>
    %cst_34 = arith.constant 0.000000e+00 : f32
    %144 = vector.shape_cast %97 : vector<16x1xf32> to vector<16x1xf32>
    %145 = vector.broadcast %144 : vector<16x1xf32> to vector<16x48xf32>
    %146 = vector.broadcast %cst_34 : f32 to vector<16x48xf32>
    %147 = arith.select %143, %145, %146 : vector<16x48xi1>, vector<16x48xf32>
    %148 = arith.addf %135, %147 : vector<16x48xf32>
    %c48_i32_35 = arith.constant 48 : i32
    %149 = vector.broadcast %c48_i32_35 : i32 to vector<16x1xi32>
    %150 = arith.cmpi eq, %141, %149 : vector<16x1xi32>
    %cst_36 = arith.constant 0.000000e+00 : f32
    %151 = vector.broadcast %cst_36 : f32 to vector<16x1xf32>
    %152 = arith.select %150, %97, %151 : vector<16x1xi1>, vector<16x1xf32>
    %153 = arith.addf %140, %152 : vector<16x1xf32>
    %154 = vector.extract_strided_slice %6 {offsets = [0, 2], sizes = [16, 1], strides = [1, 1]} : vector<16x13xi32> to vector<16x1xi32>
    %155 = vector.broadcast %154 : vector<16x1xi32> to vector<16x48xi32>
    %156 = arith.cmpi eq, %125, %155 : vector<16x48xi32>
    %cst_37 = arith.constant 0.000000e+00 : f32
    %157 = vector.shape_cast %98 : vector<16x1xf32> to vector<16x1xf32>
    %158 = vector.broadcast %157 : vector<16x1xf32> to vector<16x48xf32>
    %159 = vector.broadcast %cst_37 : f32 to vector<16x48xf32>
    %160 = arith.select %156, %158, %159 : vector<16x48xi1>, vector<16x48xf32>
    %161 = arith.addf %148, %160 : vector<16x48xf32>
    %c48_i32_38 = arith.constant 48 : i32
    %162 = vector.broadcast %c48_i32_38 : i32 to vector<16x1xi32>
    %163 = arith.cmpi eq, %154, %162 : vector<16x1xi32>
    %cst_39 = arith.constant 0.000000e+00 : f32
    %164 = vector.broadcast %cst_39 : f32 to vector<16x1xf32>
    %165 = arith.select %163, %98, %164 : vector<16x1xi1>, vector<16x1xf32>
    %166 = arith.addf %153, %165 : vector<16x1xf32>
    %167 = vector.extract_strided_slice %6 {offsets = [0, 3], sizes = [16, 1], strides = [1, 1]} : vector<16x13xi32> to vector<16x1xi32>
    %168 = vector.broadcast %167 : vector<16x1xi32> to vector<16x48xi32>
    %169 = arith.cmpi eq, %125, %168 : vector<16x48xi32>
    %cst_40 = arith.constant 0.000000e+00 : f32
    %170 = vector.shape_cast %99 : vector<16x1xf32> to vector<16x1xf32>
    %171 = vector.broadcast %170 : vector<16x1xf32> to vector<16x48xf32>
    %172 = vector.broadcast %cst_40 : f32 to vector<16x48xf32>
    %173 = arith.select %169, %171, %172 : vector<16x48xi1>, vector<16x48xf32>
    %174 = arith.addf %161, %173 : vector<16x48xf32>
    %c48_i32_41 = arith.constant 48 : i32
    %175 = vector.broadcast %c48_i32_41 : i32 to vector<16x1xi32>
    %176 = arith.cmpi eq, %167, %175 : vector<16x1xi32>
    %cst_42 = arith.constant 0.000000e+00 : f32
    %177 = vector.broadcast %cst_42 : f32 to vector<16x1xf32>
    %178 = arith.select %176, %99, %177 : vector<16x1xi1>, vector<16x1xf32>
    %179 = arith.addf %166, %178 : vector<16x1xf32>
    %180 = vector.extract_strided_slice %6 {offsets = [0, 4], sizes = [16, 1], strides = [1, 1]} : vector<16x13xi32> to vector<16x1xi32>
    %181 = vector.broadcast %180 : vector<16x1xi32> to vector<16x48xi32>
    %182 = arith.cmpi eq, %125, %181 : vector<16x48xi32>
    %cst_43 = arith.constant 0.000000e+00 : f32
    %183 = vector.shape_cast %100 : vector<16x1xf32> to vector<16x1xf32>
    %184 = vector.broadcast %183 : vector<16x1xf32> to vector<16x48xf32>
    %185 = vector.broadcast %cst_43 : f32 to vector<16x48xf32>
    %186 = arith.select %182, %184, %185 : vector<16x48xi1>, vector<16x48xf32>
    %187 = arith.addf %174, %186 : vector<16x48xf32>
    %c48_i32_44 = arith.constant 48 : i32
    %188 = vector.broadcast %c48_i32_44 : i32 to vector<16x1xi32>
    %189 = arith.cmpi eq, %180, %188 : vector<16x1xi32>
    %cst_45 = arith.constant 0.000000e+00 : f32
    %190 = vector.broadcast %cst_45 : f32 to vector<16x1xf32>
    %191 = arith.select %189, %100, %190 : vector<16x1xi1>, vector<16x1xf32>
    %192 = arith.addf %179, %191 : vector<16x1xf32>
    %193 = vector.extract_strided_slice %6 {offsets = [0, 5], sizes = [16, 1], strides = [1, 1]} : vector<16x13xi32> to vector<16x1xi32>
    %194 = vector.broadcast %193 : vector<16x1xi32> to vector<16x48xi32>
    %195 = arith.cmpi eq, %125, %194 : vector<16x48xi32>
    %cst_46 = arith.constant 0.000000e+00 : f32
    %196 = vector.shape_cast %101 : vector<16x1xf32> to vector<16x1xf32>
    %197 = vector.broadcast %196 : vector<16x1xf32> to vector<16x48xf32>
    %198 = vector.broadcast %cst_46 : f32 to vector<16x48xf32>
    %199 = arith.select %195, %197, %198 : vector<16x48xi1>, vector<16x48xf32>
    %200 = arith.addf %187, %199 : vector<16x48xf32>
    %c48_i32_47 = arith.constant 48 : i32
    %201 = vector.broadcast %c48_i32_47 : i32 to vector<16x1xi32>
    %202 = arith.cmpi eq, %193, %201 : vector<16x1xi32>
    %cst_48 = arith.constant 0.000000e+00 : f32
    %203 = vector.broadcast %cst_48 : f32 to vector<16x1xf32>
    %204 = arith.select %202, %101, %203 : vector<16x1xi1>, vector<16x1xf32>
    %205 = arith.addf %192, %204 : vector<16x1xf32>
    %c0_49 = arith.constant 0 : index
    %c1 = arith.constant 1 : index
    %c0_50 = arith.constant 0 : index
    %206 = vector.load %arg4[%c0_49, %c1, %c0_50] : memref<2x8x48xf32, #tpu.memory_space<vmem>>, vector<2x6x48xf32>
    %cst_51 = arith.constant dense<0xFF800000> : vector<2x6xf32>
    %207 = vector.multi_reduction <maximumf>, %206, %cst_51 [2] : vector<2x6x48xf32> to vector<2x6xf32>
    %208 = vector.shape_cast %207 : vector<2x6xf32> to vector<2x6x1xf32>
    %209 = vector.broadcast %208 : vector<2x6x1xf32> to vector<2x6x48xf32>
    %210 = arith.subf %206, %209 : vector<2x6x48xf32>
    %211 = math.exp %210 : vector<2x6x48xf32>
    %cst_52 = arith.constant dense<0.000000e+00> : vector<2x6xf32>
    %212 = vector.multi_reduction <add>, %211, %cst_52 [2] : vector<2x6x48xf32> to vector<2x6xf32>
    %213 = vector.shape_cast %212 : vector<2x6xf32> to vector<2x6x1xf32>
    %214 = tpu.reciprocal %213 {approx = true} : vector<2x6x1xf32> -> vector<2x6x1xf32>
    %215 = vector.broadcast %214 : vector<2x6x1xf32> to vector<2x6x48xf32>
    %216 = arith.mulf %211, %215 : vector<2x6x48xf32>
    %217 = vector.extract_strided_slice %6 {offsets = [0, 12], sizes = [16, 1], strides = [1, 1]} : vector<16x13xi32> to vector<16x1xi32>
    %218 = vector.shape_cast %217 : vector<16x1xi32> to vector<2x8x1xi32>
    %219 = vector.shape_cast %124 : vector<16x1xf32> to vector<2x8x1xf32>
    %220 = vector.extract_strided_slice %219 {offsets = [0, 1, 0], sizes = [2, 6, 1], strides = [1, 1, 1]} : vector<2x8x1xf32> to vector<2x6x1xf32>
    %221 = vector.extract_strided_slice %218 {offsets = [0, 1, 0], sizes = [2, 6, 1], strides = [1, 1, 1]} : vector<2x8x1xi32> to vector<2x6x1xi32>
    %c0_i32_53 = arith.constant 0 : i32
    %222 = vector.broadcast %c0_i32_53 : i32 to vector<2x6x1xi32>
    %223 = arith.cmpi sle, %221, %222 : vector<2x6x1xi32>
    %cst_54 = arith.constant 0.000000e+00 : f32
    %224 = vector.broadcast %cst_54 : f32 to vector<2x6x1xf32>
    %225 = arith.select %223, %224, %220 : vector<2x6x1xi1>, vector<2x6x1xf32>
    %226 = vector.shape_cast %200 : vector<16x48xf32> to vector<2x8x48xf32>
    %227 = vector.extract_strided_slice %226 {offsets = [0, 1, 0], sizes = [2, 6, 48], strides = [1, 1, 1]} : vector<2x8x48xf32> to vector<2x6x48xf32>
    %228 = vector.shape_cast %205 : vector<16x1xf32> to vector<2x8x1xf32>
    %229 = vector.extract_strided_slice %228 {offsets = [0, 1, 0], sizes = [2, 6, 1], strides = [1, 1, 1]} : vector<2x8x1xf32> to vector<2x6x1xf32>
    %230 = vector.broadcast %225 : vector<2x6x1xf32> to vector<2x6x48xf32>
    %231 = arith.mulf %227, %230 : vector<2x6x48xf32>
    %cst_55 = arith.constant 1.000000e+00 : f32
    %232 = vector.broadcast %cst_55 : f32 to vector<2x6x1xf32>
    %233 = arith.subf %232, %225 : vector<2x6x1xf32>
    %234 = arith.mulf %229, %225 : vector<2x6x1xf32>
    %235 = arith.addf %233, %234 : vector<2x6x1xf32>
    %236 = vector.broadcast %235 : vector<2x6x1xf32> to vector<2x6x48xf32>
    %237 = arith.mulf %216, %236 : vector<2x6x48xf32>
    %238 = arith.addf %231, %237 : vector<2x6x48xf32>
    %c0_56 = arith.constant 0 : index
    %c0_57 = arith.constant 0 : index
    %c0_58 = arith.constant 0 : index
    %239 = vector.load %arg5[%c0_56, %c0_57, %c0_58] : memref<2x6x48xf32, #tpu.memory_space<vmem>>, vector<2x6x48xf32>
    tpu.vector_store %arg5[%c0_56, %c0_57, %c0_58], %238 {strides = array<i32>} : memref<2x6x48xf32, #tpu.memory_space<vmem>>, vector<2x6x48xf32>,
    %240 = vector.extract_strided_slice %218 {offsets = [0, 2, 0], sizes = [2, 6, 1], strides = [1, 1, 1]} : vector<2x8x1xi32> to vector<2x6x1xi32>
    %241 = tpu.iota {dimensions = array<i32: 2>} : vector<2x6x48xi32>
    %242 = vector.broadcast %240 : vector<2x6x1xi32> to vector<2x6x48xi32>
    %243 = arith.cmpi eq, %241, %242 : vector<2x6x48xi32>
    %244 = arith.extui %243 : vector<2x6x48xi1> to vector<2x6x48xi32>
    %245 = arith.sitofp %244 : vector<2x6x48xi32> to vector<2x6x48xf32>
    %cst_59 = arith.constant 9.99999971E-10 : f32
    %246 = vector.broadcast %cst_59 : f32 to vector<2x6x48xf32>
    %247 = arith.addf %238, %246 : vector<2x6x48xf32>
    %248 = math.log %247 : vector<2x6x48xf32>
    %249 = arith.mulf %248, %245 : vector<2x6x48xf32>
    %cst_60 = arith.constant dense<0.000000e+00> : vector<2x6xf32>
    %250 = vector.multi_reduction <add>, %249, %cst_60 [2] : vector<2x6x48xf32> to vector<2x6xf32>
    %251 = vector.shape_cast %250 : vector<2x6xf32> to vector<2x6x1xf32>
    %cst_61 = arith.constant 0.000000e+00 : f32
    %252 = vector.broadcast %cst_61 : f32 to vector<2x6x1xf32>
    %253 = arith.subf %252, %251 : vector<2x6x1xf32>
    %c-100_i32 = arith.constant -100 : i32
    %254 = vector.broadcast %c-100_i32 : i32 to vector<2x6x1xi32>
    %255 = arith.cmpi eq, %240, %254 : vector<2x6x1xi32>
    %cst_62 = arith.constant 0.000000e+00 : f32
    %256 = vector.broadcast %cst_62 : f32 to vector<2x6x1xf32>
    %257 = arith.select %255, %256, %253 : vector<2x6x1xi1>, vector<2x6x1xf32>
    %cst_63 = arith.constant 0.000000e+00 : f32
    %258 = vector.broadcast %cst_63 : f32 to vector<2x6x1xf32>
    %259 = arith.cmpf one, %257, %258 : vector<2x6x1xf32>
    %260 = arith.extui %259 : vector<2x6x1xi1> to vector<2x6x1xi32>
    %261 = arith.sitofp %260 : vector<2x6x1xi32> to vector<2x6x1xf32>
    %262 = vector.shape_cast %261 : vector<2x6x1xf32> to vector<1x2x6x1xf32>
    %cst_64 = arith.constant dense<0.000000e+00> : vector<1xf32>
    %263 = vector.multi_reduction <add>, %262, %cst_64 [1, 2, 3] : vector<1x2x6x1xf32> to vector<1xf32>
    %264 = vector.shape_cast %263 : vector<1xf32> to vector<1x1x1x1xf32>
    %265 = vector.extract %264[0, 0, 0, 0] : f32 from vector<1x1x1x1xf32>
    %cst_65 = arith.constant 1.000000e+00 : f32
    %266 = arith.maximumf %265, %cst_65 : f32
    %267 = vector.shape_cast %257 : vector<2x6x1xf32> to vector<1x2x6x1xf32>
    %cst_66 = arith.constant dense<0.000000e+00> : vector<1xf32>
    %268 = vector.multi_reduction <add>, %267, %cst_66 [1, 2, 3] : vector<1x2x6x1xf32> to vector<1xf32>
    %269 = vector.shape_cast %268 : vector<1xf32> to vector<1x1x1x1xf32>
    %270 = vector.extract %269[0, 0, 0, 0] : f32 from vector<1x1x1x1xf32>
    %271 = arith.divf %270, %266 : f32
    %272 = vector.broadcast %271 : f32 to vector<1x1xf32>
    %c0_67 = arith.constant 0 : index
    %c0_68 = arith.constant 0 : index
    %273 = vector.load %arg6[%c0_67, %c0_68] : memref<1x1xf32, #tpu.memory_space<vmem>>, vector<1x1xf32>
    tpu.vector_store %arg6[%c0_67, %c0_68], %272 {strides = array<i32>} : memref<1x1xf32, #tpu.memory_space<vmem>>, vector<1x1xf32>,
    return
  }
  func.func @transform_0(%arg0: i32) -> (i32, i32) {
    %c0_i32 = arith.constant 0 : i32
    %c0_i32_0 = arith.constant 0 : i32
    %c0_i32_1 = arith.constant 0 : i32
    return %c0_i32, %c0_i32_0 : i32, i32
  }
  func.func @transform_1(%arg0: i32) -> (i32, i32) {
    %c0_i32 = arith.constant 0 : i32
    %c0_i32_0 = arith.constant 0 : i32
    %c0_i32_1 = arith.constant 0 : i32
    return %c0_i32, %c0_i32_0 : i32, i32
  }
  func.func @transform_2(%arg0: i32) -> (i32, i32) {
    %c0_i32 = arith.constant 0 : i32
    %c0_i32_0 = arith.constant 0 : i32
    %c0_i32_1 = arith.constant 0 : i32
    return %c0_i32, %c0_i32_0 : i32, i32
  }
  func.func @transform_3(%arg0: i32) -> (i32, i32, i32) {
    %c0_i32 = arith.constant 0 : i32
    %c0_i32_0 = arith.constant 0 : i32
    %c0_i32_1 = arith.constant 0 : i32
    %c0_i32_2 = arith.constant 0 : i32
    return %c0_i32, %c0_i32_0, %c0_i32_1 : i32, i32, i32
  }
  func.func @transform_4(%arg0: i32) -> (i32, i32, i32) {
    %c0_i32 = arith.constant 0 : i32
    %c0_i32_0 = arith.constant 0 : i32
    %c0_i32_1 = arith.constant 0 : i32
    %c0_i32_2 = arith.constant 0 : i32
    return %c0_i32, %c0_i32_0, %c0_i32_1 : i32, i32, i32
  }
  func.func @transform_5(%arg0: i32) -> (i32, i32) {
    %c0_i32 = arith.constant 0 : i32
    %c0_i32_0 = arith.constant 0 : i32
    %c0_i32_1 = arith.constant 0 : i32
    return %c0_i32, %c0_i32_0 : i32, i32
  }
}

</mosaic_0001>

<bundles_post_ra>
// kernel: tpu_custom_call.1
= control target key start
LH: loop header
LB: loop body
LE: loop exit
PB: predicated region body
PF: predicated region fallthrough
CT: control target
= control target key end

     0   :  { %vm39_vm0 = vcmask 269312   ;;  %vm82_vm1 = vcmask 1040384   ;;  %s1932_s0 = inlined_call_operand.vmem [shape: f32[112,33], index: 0, kind: input, shape index: {}]   ;;  %s1933_s1 = inlined_call_operand.vmem [shape: f32[33,49], index: 1, kind: input, shape index: {}]   ;;  %s1934_s2 = inlined_call_operand.vmem [shape: s32[16,13], index: 2, kind: input, shape index: {}]   ;;  %s1935_s3 = inlined_call_operand.vmem [shape: f32[2,8,48], index: 3, kind: input, shape index: {}]   ;;  %s1936_s4 = inlined_call_operand.vmem [shape: f32[2,6,48], index: 4, kind: output, shape index: {0}]   ;;  %s1937_s5 = inlined_call_operand.hbm [shape: f32[1,1], index: 5, kind: output, shape index: {1}]  }
   0x1   :  { %v34_v0 = vld [vmem:[%s1933_s1] sm:$0xff]  ;;  %v35_v1 = vld [vmem:[%s1933_s1 + $0x8] sm:$0xff]  ;;  %v36_v2 = vld [vmem:[%s1933_s1 + $0x10] sm:$0xff] }
   0x2   :  { %v1144_v3 = vpack.c.bf16 %v35_v1, %v34_v0  ;;  %v37_v4 = vld [vmem:[%s1933_s1 + $0x18] sm:$0xff]  ;;  %v20_v5 = vld [vmem:[%s1932_s0] sm:$0xff] }
   0x3   :  { %v1148_v6 = vpack.c.bf16 %v37_v4, %v36_v2  ;;  %1123 = vmatprep.mubr.msk.f32.mxu0 %vm39_vm0, %v20_v5  ;;  %v28_v7 = vld [vmem:[%s1932_s0 + $0x40] sm:$0xff] }
   0x4   :  { %1145 = vmatprep.subr.bf16.mxu0 %v1144_v3  ;;  %1152 = vmatprep.subr.bf16.mxu1 %v1144_v3  ;;  %v38_v8 = vld [vmem:[%s1933_s1 + $0x20] sm:$0x1] }
   0x5   :  { %1147 = vmatpush3.bf16.msra.mxu0 %v1144_v3  ;;  %1155 = vmatpush3.bf16.msra.mxu1 %v1144_v3 }
   0x6   :  { %1149 = vmatprep.subr.bf16.mxu0 %v1148_v6  ;;  %1153 = vmatprep.subr.bf16.mxu1 %v1148_v6 }
   0x7   :  { %1135 = vmatprep.mubr.msk.f32.mxu1 %vm39_vm0, %v28_v7 }
   0x8   :  { %11 = vsyncpa [#allocation3], 0  ;;  %v21_v9 = vld [vmem:[%s1932_s0 + $0x8] sm:$0xff]  ;;  %v22_v11 = vld [vmem:[%s1932_s0 + $0x10] sm:$0xff]  ;;  %s1301_s30 = smov 16   ;;  %vm241_vm2 = vcmask 130048  }
   0x9   :  { %1151 = vmatpush3.bf16.msra.mxu0 %v1148_v6  ;;  %1156 = vmatpush3.bf16.msra.mxu1 %v1148_v6  ;;  %v29_v10 = vld [vmem:[%s1932_s0 + $0x48] sm:$0xff]  ;;  %v30_v12 = vld [vmem:[%s1932_s0 + $0x50] sm:$0xff]  ;;  %v23_v13 = vld [vmem:[%s1932_s0 + $0x18] sm:$0xff]  ;;  %s1303_s10 = smov 127   ;;  %s1304_s11 = smov 125   ;;  %vm860_vm9 = vcmask 390144  }
   0xa   :  { %1121 = vmatprep.subr.msk.mxu0 %vm82_vm1, %v38_v8  ;;  %1154 = vmatprep.subr.msk.mxu1 %vm82_vm1, %v38_v8  ;;  %v31_v14 = vld [vmem:[%s1932_s0 + $0x58] sm:$0xff]  ;;  %v24_v15 = vld [vmem:[%s1932_s0 + $0x20] sm:$0xff]  ;;  %v25_v17 = vld [vmem:[%s1932_s0 + $0x28] sm:$0xff]  ;;  %s1305_s12 = smov 126   ;;  %s1306_s1 = smov 124  }
   0xb   :  { %v32_v16 = vld [vmem:[%s1932_s0 + $0x60] sm:$0xff]  ;;  %v33_v18 = vld [vmem:[%s1932_s0 + $0x68] sm:$0xff]  ;;  %v26_v19 = vld [vmem:[%s1932_s0 + $0x30] sm:$0xff]  ;;  %s1307_s13 = smov 123   ;;  %s1308_s14 = smov 1  }
   0xc   :  { %v27_v20 = vld [vmem:[%s1932_s0 + $0x38] sm:$0xff]  ;;  %s1302_s0 = smov 112   ;;  %s1309_s15 = smov 2  }
   0xd   :  { %1122 = vmatpush3.msk.msra.mxu0 %vm82_vm1, %v38_v8  ;;  %1157 = vmatpush3.msk.msra.mxu1 %vm82_vm1, %v38_v8  ;;  %s1310_s16 = smov 3   ;;  %s1311_s17 = smov 4  }
   0xe   :  { %1124 = vmatmul.mubr.msk.f32.vlgmr.msra.gmra.mrb[0].mxu0 %vm39_vm0, %v21_v9  ;;  %1136 = vmatmul.mubr.msk.f32.vlgmr.msra.gmra.mrb[0].mxu1 %vm39_vm0, %v29_v10  ;;  %v1498_v9 = vld [vmem:[%s1934_s2 + $0x8] sm:$0xff]  ;;  %s1312_s18 = smov 5   ;;  %s1318_s19 = smov 111  }
   0xf   :  { %1126 = vmatprep.mubr.msk.f32.mxu0 %vm39_vm0, %v22_v11  ;;  %1138 = vmatprep.mubr.msk.f32.mxu1 %vm39_vm0, %v30_v12  ;;  %vm251_vm3 = vcmp.gt.s32.totalorder %v1498_v9, 0  ;;  %v1504_v12 = vld [vmem:[%s1934_s2] sm:$0xff]  ;;  %s1319_s20 = smov 122   ;;  %s1320_s21 = smov 108   ;;  %vm687_vm6 = vcmp.eq.s32.totalorder %v1498_v9, 48  ;;  %vm884_vm8 = vcmp.le.s32.totalorder %v1498_v9, 0 }
  0x10   :  { %vm250_vm4 = vcmp.gt.s32.totalorder %v1504_v12, 0  ;;  %vm686_vm5 = vcmp.eq.s32.totalorder %v1504_v12, 48  ;;  %vm883_vm7 = vcmp.le.s32.totalorder %v1504_v12, 0  ;;  %s1321_s22 = smov 116   ;;  %s1332_s8 = smov 1.0  }
  0x12   :  { %1127 = vmatmul.mubr.msk.f32.gmra.mrb[2].mxu0 %vm39_vm0, %v23_v13  ;;  %1139 = vmatmul.mubr.msk.f32.gmra.mrb[2].mxu1 %vm39_vm0, %v31_v14 }
  0x13   :  { %1129 = vmatprep.mubr.msk.f32.mxu0 %vm39_vm0, %v24_v15  ;;  %1141 = vmatprep.mubr.msk.f32.mxu1 %vm39_vm0, %v32_v16 }
  0x16   :  { %1130 = vmatmul.mubr.msk.f32.gmra.mrb[4].mxu0 %vm39_vm0, %v25_v17  ;;  %1142 = vmatmul.mubr.msk.f32.gmra.mrb[4].mxu1 %vm39_vm0, %v33_v18 }
  0x17   :  { %1132 = vmatprep.mubr.msk.f32.mxu0 %vm39_vm0, %v26_v19 }
  0x1a   :  { %1133 = vmatmul.mubr.msk.f32.gmra.mrb[6].mxu0 %vm39_vm0, %v27_v20 }
  0xe1   :  { %v1435_v21 = vpop.f32.mrb[0].mxu0  ;;  %v1437_v22 = vpop.f32.mrb[0].mxu1 }
  0xe2   :  { %v1439_v23 = vpop.f32.mrb[1].mxu0  ;;  %v1441_v24 = vpop.f32.mrb[1].mxu1 }
  0xe3   :  { %225 = vrot.lane.b32.xlu0 %v1439_v23, %s1301_s30 }
  0xe5   :  { %v1444_v25 = vpop.f32.mrb[2].mxu0  ;;  %v1446_v26 = vpop.f32.mrb[2].mxu1 }
  0xe6   :  { %v1448_v27 = vpop.f32.mrb[3].mxu0  ;;  %v1450_v28 = vpop.f32.mrb[3].mxu1 }
  0xe7   :  { %227 = vrot.lane.b32.xlu0 %v1435_v21, %s1301_s30 }
  0xe9   :  { %v1453_v29 = vpop.f32.mrb[4].mxu0  ;;  %v1143_v30 = vpop.f32.mrb[4].mxu1 }
  0xea   :  { %v1455_v31 = vpop.f32.mrb[5].mxu0  ;;  %v212_v32 = vpop.f32.mrb[5].mxu1 }
  0xed   :  { %v1457_v33 = vpop.f32.mrb[6].mxu0 }
  0xee   :  { %v1459_v34 = vpop.f32.mrb[7].mxu0 }
 0x155   :  { %v226_v35 = vpop.permute.xlu0 %225 }
 0x156   :  { %v274_v36 = vmul.f32 %v226_v35, %v1459_v34  ;;  %v294_v39 = vmul.f32 %v226_v35, %v1441_v24  ;;  %v314_v41 = vmul.f32 %v226_v35, %v1450_v28  ;;  %v334_v43 = vmul.f32 %v226_v35, %v212_v32 }
 0x157   :  { %v254_v44 = vmul.f32 %v226_v35, %v1455_v31  ;;  %v231_v45 = vmul.f32 %v226_v35, %v1448_v27 }
 0x158   :  { %278 = vrot.lane.b32.xlu0 %v274_v36, %s1302_s0 }
 0x159   :  { %v228_v37 = vpop.permute.xlu0 %227 }
 0x15a   :  { %v255_v38 = vmul.f32 %v1453_v29, %v228_v37  ;;  %v275_v40 = vmul.f32 %v1457_v33, %v228_v37  ;;  %v295_v42 = vmul.f32 %v1437_v22, %v228_v37  ;;  %v315_v46 = vmul.f32 %v1446_v26, %v228_v37 }
 0x15b   :  { %v335_v47 = vmul.f32 %v1143_v30, %v228_v37  ;;  %v232_v48 = vmul.f32 %v1444_v25, %v228_v37 }
 0x15c   :  { %260 = vrot.lane.b32.xlu1 %v255_v38, %s1302_s0  ;;  %298 = vrot.lane.b32.xlu0 %v294_v39, %s1302_s0 }
 0x160   :  { %280 = vrot.lane.b32.xlu1 %v275_v40, %s1302_s0  ;;  %318 = vrot.lane.b32.xlu0 %v314_v41, %s1302_s0 }
 0x164   :  { %300 = vrot.lane.b32.xlu1 %v295_v42, %s1302_s0  ;;  %338 = vrot.lane.b32.xlu0 %v334_v43, %s1302_s0 }
 0x168   :  { %258 = vrot.lane.b32.xlu1 %v254_v44, %s1302_s0  ;;  %235 = vrot.lane.b32.xlu0 %v231_v45, %s1302_s0 }
 0x16c   :  { %320 = vrot.lane.b32.xlu1 %v315_v46, %s1302_s0 }
 0x170   :  { %340 = vrot.lane.b32.xlu1 %v335_v47, %s1302_s0 }
 0x174   :  { %237 = vrot.lane.b32.xlu1 %v232_v48, %s1302_s0 }
 0x1ca   :  { %v279_v49 = vpop.permute.xlu0 %278 }
 0x1cb   :  { %v284_v2 = vsel %vm241_vm2, %v279_v49, 0.0 }
 0x1ce   :  { %v261_v50 = vpop.permute.xlu1 %260  ;;  %v299_v51 = vpop.permute.xlu0 %298 }
 0x1cf   :  { %v267_v52 = vsel %vm241_vm2, %v261_v50, 0.0  ;;  %v304_v56 = vsel %vm241_vm2, %v299_v51, 0.0 }
 0x1d0   :  { %268 = vadd.xlane.f32.xlu1 %v267_v52 }
 0x1d2   :  { %v281_v53 = vpop.permute.xlu1 %280  ;;  %v319_v54 = vpop.permute.xlu0 %318 }
 0x1d3   :  { %v287_v55 = vsel %vm241_vm2, %v281_v53, 0.0  ;;  %v324_v60 = vsel %vm241_vm2, %v319_v54, 0.0 }
 0x1d4   :  { %288 = vadd.xlane.f32.xlu0 %v287_v55  ;;  %305 = vadd.xlane.f32.xlu1 %v304_v56 }
 0x1d6   :  { %v301_v57 = vpop.permute.xlu1 %300  ;;  %v339_v58 = vpop.permute.xlu0 %338 }
 0x1d7   :  { %v307_v59 = vsel %vm241_vm2, %v301_v57, 0.0  ;;  %v344_v63 = vsel %vm241_vm2, %v339_v58, 0.0 }
 0x1d8   :  { %308 = vadd.xlane.f32.xlu0 %v307_v59  ;;  %325 = vadd.xlane.f32.xlu1 %v324_v60 }
 0x1da   :  { %v259_v61 = vpop.permute.xlu1 %258  ;;  %v236_v0 = vpop.permute.xlu0 %235 }
 0x1db   :  { %v264_v62 = vsel %vm241_vm2, %v259_v61, 0.0  ;;  %v242_v3 = vsel %vm241_vm2, %v236_v0, 0.0 }
 0x1dc   :  { %265 = vadd.xlane.f32.xlu0 %v264_v62  ;;  %345 = vadd.xlane.f32.xlu1 %v344_v63 }
 0x1de   :  { %v321_v1 = vpop.permute.xlu1 %320 }
 0x1df   :  { %v327_v5 = vsel %vm241_vm2, %v321_v1, 0.0 }
 0x1e0   :  { %285 = vadd.xlane.f32.xlu0 %v284_v2  ;;  %243 = vadd.xlane.f32.xlu1 %v242_v3 }
 0x1e2   :  { %v341_v4 = vpop.permute.xlu1 %340 }
 0x1e3   :  { %v347_v6 = vsel %vm241_vm2, %v341_v4, 0.0 }
 0x1e4   :  { %328 = vadd.xlane.f32.xlu0 %v327_v5 }
 0x1e6   :  { %v238_v7 = vpop.permute.xlu1 %237 }
 0x1e7   :  { %v245_v8 = vsel %vm241_vm2, %v238_v7, 0.0 }
 0x1e8   :  { %348 = vadd.xlane.f32.xlu0 %v347_v6 }
 0x1ec   :  { %246 = vadd.xlane.f32.xlu0 %v245_v8 }
 0x25d   :  { %v269_v10 = vpop.xlane.xlu1 %268 }
 0x25e   :  { %v271_v11 = vmul.f32 0.25, %v269_v10 }
 0x260   :  { %v1508_v13 = vsel %vm251_vm3, -1e+09, %v271_v11 }
 0x261   :  { %358 = vrot.lane.b32.xlu0 %v1508_v13, %s1303_s10  ;;  %v306_v14 = vpop.xlane.xlu1 %305  ;;  %v289_v15 = vpop.xlane.xlu0 %288 }
 0x262   :  { %v310_v16 = vmul.f32 0.25, %v306_v14  ;;  %v291_v17 = vmul.f32 0.25, %v289_v15 }
 0x264   :  { %v1515_v18 = vsel %vm250_vm4, -1e+09, %v310_v16  ;;  %v1519_v19 = vsel %vm251_vm3, -1e+09, %v291_v17 }
 0x265   :  { %376 = vrot.lane.b32.xlu0 %v1515_v18, %s1304_s11  ;;  %v326_v20 = vpop.xlane.xlu1 %325  ;;  %368 = vrot.lane.b32.xlu1 %v1519_v19, %s1305_s12  ;;  %v309_v30 = vpop.xlane.xlu0 %308 }
 0x266   :  { %v330_v32 = vmul.f32 0.25, %v326_v20  ;;  %v311_v35 = vmul.f32 0.25, %v309_v30 }
 0x268   :  { %v1527_v36 = vsel %vm250_vm4, -1e+09, %v330_v32  ;;  %v1531_v37 = vsel %vm251_vm3, -1e+09, %v311_v35 }
 0x269   :  { %386 = vrot.lane.b32.xlu0 %v1527_v36, %s1306_s1  ;;  %v346_v38 = vpop.xlane.xlu1 %345  ;;  %378 = vrot.lane.b32.xlu1 %v1531_v37, %s1304_s11  ;;  %v266_v39 = vpop.xlane.xlu0 %265 }
 0x26a   :  { %v350_v40 = vmul.f32 0.25, %v346_v38  ;;  %v270_v41 = vmul.f32 0.25, %v266_v39 }
 0x26c   :  { %v1539_v42 = vsel %vm250_vm4, -1e+09, %v350_v40  ;;  %v272_v43 = vsel %vm250_vm4, -1e+09, %v270_v41 }
 0x26d   :  { %396 = vrot.lane.b32.xlu0 %v1539_v42, %s1307_s13  ;;  %356 = vrot.lane.b32.xlu1 %v272_v43, %s1303_s10  ;;  %v286_v44 = vpop.xlane.xlu0 %285  ;;  %v244_v53 = vpop.xlane.xlu1 %243 }
 0x26e   :  { %v290_v45 = vmul.f32 0.25, %v286_v44  ;;  %v248_v58 = vmul.f32 0.25, %v244_v53 }
 0x270   :  { %v1548_v46 = vsel %vm250_vm4, -1e+09, %v290_v45  ;;  %v1566_v62 = vsel %vm250_vm4, -1e+09, %v248_v58 }
 0x271   :  { %366 = vrot.lane.b32.xlu1 %v1548_v46, %s1305_s12  ;;  %v329_v47 = vpop.xlane.xlu0 %328 }
 0x272   :  { %v331_v48 = vmul.f32 0.25, %v329_v47 }
 0x274   :  { %v1554_v49 = vsel %vm251_vm3, -1e+09, %v331_v48 }
 0x275   :  { %388 = vrot.lane.b32.xlu1 %v1554_v49, %s1306_s1  ;;  %v349_v50 = vpop.xlane.xlu0 %348 }
 0x276   :  { %v351_v51 = vmul.f32 0.25, %v349_v50 }
 0x278   :  { %v1560_v52 = vsel %vm251_vm3, -1e+09, %v351_v51 }
 0x279   :  { %398 = vrot.lane.b32.xlu1 %v1560_v52, %s1307_s13  ;;  %v247_v54 = vpop.xlane.xlu0 %246 }
 0x27a   :  { %v249_v60 = vmul.f32 0.25, %v247_v54 }
 0x27c   :  { %v1571_v0 = vsel %vm251_vm3, -1e+09, %v249_v60 }
 0x2d3   :  { %v359_v55 = vpop.permute.xlu0 %358 }
 0x2d4   :  { %v363_v3 = vmax.f32 %v1571_v0, %v359_v55 }
 0x2d7   :  { %v369_v56 = vpop.permute.xlu1 %368  ;;  %v377_v59 = vpop.permute.xlu0 %376 }
 0x2d8   :  { %v373_v5 = vmax.f32 %v363_v3, %v369_v56 }
 0x2db   :  { %v379_v57 = vpop.permute.xlu1 %378  ;;  %v387_v1 = vpop.permute.xlu0 %386 }
 0x2dc   :  { %v383_v8 = vmax.f32 %v373_v5, %v379_v57 }
 0x2df   :  { %v357_v61 = vpop.permute.xlu1 %356  ;;  %v397_v11 = vpop.permute.xlu0 %396 }
 0x2e0   :  { %v362_v63 = vmax.f32 %v1566_v62, %v357_v61 }
 0x2e3   :  { %v367_v2 = vpop.permute.xlu1 %366 }
 0x2e4   :  { %v372_v4 = vmax.f32 %v362_v63, %v367_v2 }
 0x2e6   :  { %v382_v6 = vmax.f32 %v372_v4, %v377_v59 }
 0x2e7   :  { %v389_v7 = vpop.permute.xlu1 %388 }
 0x2e8   :  { %v392_v10 = vmax.f32 %v382_v6, %v387_v1  ;;  %v393_v15 = vmax.f32 %v383_v8, %v389_v7 }
 0x2ea   :  { %v1574_v14 = vmax.f32 %v392_v10, %v397_v11  ;;  %v1313_v10 = vmov 6  }
 0x2eb   :  { %v399_v16 = vpop.permute.xlu1 %398  ;;  %1198 = vset.pattern.permute.xlu0 %v1313_v10  ;;  %1197 = vset.pattern.permute.xlu1 %v1313_v10 }
 0x2ec   :  { %v1576_v17 = vmax.f32 %v393_v15, %v399_v16  ;;  %412 = vrot.lane.b32.xlu0 %v1574_v14, %s1308_s14  ;;  %v404_v20 = vsub.f32 %v1566_v62, %v1574_v14 }
 0x2ee   :  { %414 = vrot.lane.b32.xlu1 %v1576_v17, %s1308_s14  ;;  %v405_v30 = vsub.f32 %v1571_v0, %v1576_v17  ;;  %v406_v11 = vmul.f32 1.442695, %v404_v20 }
 0x2f0   :  { %424 = vrot.lane.b32.xlu0 %v1574_v14, %s1309_s15  ;;  %v408_v15 = vmul.f32 1.442695, %v405_v30 }
 0x2f2   :  { %426 = vrot.lane.b32.xlu1 %v1576_v17, %s1309_s15 }
 0x2f4   :  { %436 = vrot.lane.b32.xlu0 %v1574_v14, %s1310_s16 }
 0x2f6   :  { %438 = vrot.lane.b32.xlu1 %v1576_v17, %s1310_s16 }
 0x2f8   :  { %448 = vrot.lane.b32.xlu0 %v1574_v14, %s1311_s17 }
 0x2fa   :  { %450 = vrot.lane.b32.xlu1 %v1576_v17, %s1311_s17 }
 0x2fc   :  { %460 = vrot.lane.b32.xlu0 %v1574_v14, %s1312_s18 }
 0x2fe   :  { %462 = vrot.lane.b32.xlu1 %v1576_v17, %s1312_s18 }
 0x35e   :  { %v413_v32 = vpop.permute.xlu0 %412 }
 0x35f   :  { %v418_v35 = vsub.f32 %v272_v43, %v413_v32 }
 0x360   :  { %v415_v38 = vpop.permute.xlu1 %414 }
 0x361   :  { %v420_v39 = vmul.f32 1.442695, %v418_v35  ;;  %v419_v40 = vsub.f32 %v1508_v13, %v415_v38 }
 0x362   :  { %v425_v41 = vpop.permute.xlu0 %424 }
 0x363   :  { %1225 = vpow2.f32 %v420_v39  ;;  %v422_v44 = vmul.f32 1.442695, %v419_v40  ;;  %v430_v45 = vsub.f32 %v1548_v46, %v425_v41 }
 0x364   :  { %v427_v47 = vpop.permute.xlu1 %426 }
 0x365   :  { %1227 = vpow2.f32 %v422_v44  ;;  %v432_v48 = vmul.f32 1.442695, %v430_v45  ;;  %v431_v50 = vsub.f32 %v1519_v19, %v427_v47 }
 0x366   :  { %v437_v51 = vpop.permute.xlu0 %436 }
 0x367   :  { %1229 = vpow2.f32 %v432_v48  ;;  %v434_v53 = vmul.f32 1.442695, %v431_v50  ;;  %v442_v54 = vsub.f32 %v1515_v18, %v437_v51 }
 0x368   :  { %v439_v43 = vpop.permute.xlu1 %438 }
 0x369   :  { %1231 = vpow2.f32 %v434_v53  ;;  %v444_v55 = vmul.f32 1.442695, %v442_v54  ;;  %v443_v13 = vsub.f32 %v1531_v37, %v439_v43 }
 0x36a   :  { %v449_v56 = vpop.permute.xlu0 %448 }
 0x36b   :  { %1233 = vpow2.f32 %v444_v55  ;;  %v446_v57 = vmul.f32 1.442695, %v443_v13  ;;  %v454_v46 = vsub.f32 %v1527_v36, %v449_v56 }
 0x36c   :  { %v451_v58 = vpop.permute.xlu1 %450 }
 0x36d   :  { %v1608_v59 = vpop.eup %1225  ;;  %1235 = vpow2.f32 %v446_v57  ;;  %v456_v19 = vmul.f32 1.442695, %v454_v46  ;;  %v455_v60 = vsub.f32 %v1554_v49, %v451_v58  ;;  %v1314_v46 = vmov 7  }
 0x36e   :  { %474 = vrot.lane.b32.xlu0 %v1608_v59, %s1303_s10  ;;  %v461_v18 = vpop.permute.xlu0 %460  ;;  %v1315_v58 = vmov 8  }
 0x36f   :  { %v1613_v61 = vpop.eup %1227  ;;  %1237 = vpow2.f32 %v456_v19  ;;  %v458_v37 = vmul.f32 1.442695, %v455_v60  ;;  %v466_v63 = vsub.f32 %v1539_v42, %v461_v18 }
 0x370   :  { %476 = vrot.lane.b32.xlu1 %v1613_v61, %s1303_s10  ;;  %v463_v36 = vpop.permute.xlu1 %462 }
 0x371   :  { %v1618_v1 = vpop.eup %1229  ;;  %1239 = vpow2.f32 %v458_v37  ;;  %v468_v2 = vmul.f32 1.442695, %v466_v63  ;;  %v467_v49 = vsub.f32 %v1560_v52, %v463_v36 }
 0x372   :  { %484 = vrot.lane.b32.xlu0 %v1618_v1, %s1305_s12 }
 0x373   :  { %v1623_v3 = vpop.eup %1231  ;;  %1241 = vpow2.f32 %v468_v2  ;;  %v470_v4 = vmul.f32 1.442695, %v467_v49 }
 0x374   :  { %486 = vrot.lane.b32.xlu1 %v1623_v3, %s1305_s12 }
 0x375   :  { %v1627_v42 = vpop.eup %1233  ;;  %1243 = vpow2.f32 %v470_v4  ;;  %v1316_v4 = vmov 9  }
 0x376   :  { %494 = vrot.lane.b32.xlu0 %v1627_v42, %s1304_s11  ;;  %1245 = vpow2.f32 %v406_v11 }
 0x377   :  { %v1631_v5 = vpop.eup %1235  ;;  %1247 = vpow2.f32 %v408_v15  ;;  %v1317_v15 = vmov 10  }
 0x378   :  { %496 = vrot.lane.b32.xlu1 %v1631_v5, %s1304_s11 }
 0x379   :  { %v1635_v52 = vpop.eup %1237 }
 0x37a   :  { %504 = vrot.lane.b32.xlu0 %v1635_v52, %s1306_s1 }
 0x37b   :  { %v1639_v6 = vpop.eup %1239 }
 0x37c   :  { %506 = vrot.lane.b32.xlu1 %v1639_v6, %s1306_s1 }
 0x37d   :  { %v1643_v7 = vpop.eup %1241 }
 0x37e   :  { %514 = vrot.lane.b32.xlu0 %v1643_v7, %s1307_s13 }
 0x37f   :  { %v1647_v8 = vpop.eup %1243 }
 0x380   :  { %516 = vrot.lane.b32.xlu1 %v1647_v8, %s1307_s13  ;;  %v1246_v39 = vpop.eup %1245 }
 0x381   :  { %v1248_v44 = vpop.eup %1247 }
 0x3e0   :  { %v475_v16 = vpop.permute.xlu0 %474 }
 0x3e1   :  { %v480_v41 = vadd.f32 %v1246_v39, %v475_v16 }
 0x3e2   :  { %v477_v32 = vpop.permute.xlu1 %476 }
 0x3e3   :  { %v481_v47 = vadd.f32 %v1248_v44, %v477_v32 }
 0x3e4   :  { %v485_v35 = vpop.permute.xlu0 %484 }
 0x3e5   :  { %v490_v48 = vadd.f32 %v485_v35, %v480_v41 }
 0x3e6   :  { %v487_v38 = vpop.permute.xlu1 %486 }
 0x3e7   :  { %v491_v62 = vadd.f32 %v487_v38, %v481_v47 }
 0x3e8   :  { %v495_v40 = vpop.permute.xlu0 %494 }
 0x3e9   :  { %v500_v14 = vadd.f32 %v495_v40, %v490_v48 }
 0x3ea   :  { %v497_v45 = vpop.permute.xlu1 %496 }
 0x3eb   :  { %v501_v51 = vadd.f32 %v497_v45, %v491_v62 }
 0x3ec   :  { %v505_v50 = vpop.permute.xlu0 %504 }
 0x3ed   :  { %v510_v0 = vadd.f32 %v505_v50, %v500_v14 }
 0x3ee   :  { %v507_v20 = vpop.permute.xlu1 %506 }
 0x3ef   :  { %v511_v30 = vadd.f32 %v507_v20, %v501_v51 }
 0x3f0   :  { %v515_v17 = vpop.permute.xlu0 %514 }
 0x3f1   :  { %v520_v53 = vadd.f32 %v515_v17, %v510_v0 }
 0x3f2   :  { %v517_v54 = vpop.permute.xlu1 %516 }
 0x3f3   :  { %1249 = vrcp.f32 %v520_v53  ;;  %v521_v43 = vadd.f32 %v517_v54, %v511_v30 }
 0x3f5   :  { %1251 = vrcp.f32 %v521_v43 }
 0x3fd   :  { %v1657_v55 = vpop.eup %1249 }
 0x3fe   :  { %528 = vrot.lane.b32.xlu0 %v1657_v55, %s1308_s14  ;;  %v1678_v56 = vmul.f32 %v1657_v55, %v1246_v39 }
 0x3ff   :  { %v1661_v13 = vpop.eup %1251 }
 0x400   :  { %530 = vrot.lane.b32.xlu1 %v1661_v13, %s1308_s14  ;;  %v1682_v57 = vmul.f32 %v1661_v13, %v1248_v44 }
 0x402   :  { %536 = vrot.lane.b32.xlu0 %v1657_v55, %s1309_s15 }
 0x404   :  { %538 = vrot.lane.b32.xlu1 %v1661_v13, %s1309_s15 }
 0x406   :  { %544 = vrot.lane.b32.xlu0 %v1657_v55, %s1310_s16 }
 0x408   :  { %546 = vrot.lane.b32.xlu1 %v1661_v13, %s1310_s16 }
 0x40a   :  { %552 = vrot.lane.b32.xlu0 %v1657_v55, %s1311_s17 }
 0x40c   :  { %554 = vrot.lane.b32.xlu1 %v1661_v13, %s1311_s17 }
 0x40e   :  { %570 = vperm.xlu0 %1198, %v1678_v56  }
 0x410   :  { %575 = vperm.xlu1 %1197, %v1682_v57  }
 0x412   :  { %1199 = vset.pattern.permute.xlu0 %v1314_v46 }
 0x414   :  { %1200 = vset.pattern.permute.xlu1 %v1315_v58 }
 0x470   :  { %v529_v19 = vpop.permute.xlu0 %528 }
 0x472   :  { %v531_v60 = vpop.permute.xlu1 %530 }
 0x473   :  { %v1686_v18 = vmul.f32 %v1613_v61, %v531_v60 }
 0x474   :  { %v537_v37 = vpop.permute.xlu0 %536 }
 0x475   :  { %587 = vperm.xlu0 %1199, %v1686_v18  }
 0x476   :  { %v539_v63 = vpop.permute.xlu1 %538 }
 0x477   :  { %v1690_v36 = vmul.f32 %v1623_v3, %v539_v63 }
 0x478   :  { %v545_v2 = vpop.permute.xlu0 %544 }
 0x479   :  { %v1693_v49 = vmul.f32 %v1627_v42, %v545_v2  ;;  %601 = vperm.xlu1 %1200, %v1690_v36   ;;  %1204 = vset.pattern.permute.xlu0 %v1316_v4  ;;  %v534_v42 = vmul.f32 %v1608_v59, %v529_v19 }
 0x47a   :  { %v547_v10 = vpop.permute.xlu1 %546 }
 0x47b   :  { %v1697_v11 = vmul.f32 %v1631_v5, %v547_v10  ;;  %610 = vperm.xlu0 %1204, %v1693_v49   ;;  %v542_v5 = vmul.f32 %v1618_v1, %v537_v37 }
 0x47c   :  { %v553_v16 = vpop.permute.xlu0 %552 }
 0x47d   :  { %1201 = vset.pattern.permute.xlu1 %v1316_v4  ;;  %v558_v32 = vmul.f32 %v1635_v52, %v553_v16 }
 0x47e   :  { %v555_v61 = vpop.permute.xlu1 %554  ;;  %615 = vperm.xlu1 %1201, %v1697_v11  }
 0x47f   :  { %v1702_v3 = vmul.f32 %v1639_v6, %v555_v61  ;;  %1206 = vset.pattern.permute.xlu0 %v1317_v15 }
 0x481   :  { %629 = vperm.xlu0 %1206, %v1702_v3  }
 0x482   :  { %1202 = vset.pattern.permute.xlu1 %v1314_v46 }
 0x483   :  { %582 = vperm.xlu1 %1202, %v534_v42  }
 0x487   :  { %1203 = vset.pattern.permute.xlu1 %v1315_v58 }
 0x488   :  { %596 = vperm.xlu1 %1203, %v542_v5  }
 0x48c   :  { %1205 = vset.pattern.permute.xlu1 %v1317_v15 }
 0x48d   :  { %624 = vperm.xlu1 %1205, %v558_v32   ;;  %v1710_v6 = vpop.permute.xlu0 %570 }
 0x48e   :  { %v578_v62 = vmul.f32 %v1710_v6, %v1448_v27 }
 0x48f   :  { %v1712_v59 = vpop.permute.xlu1 %575 }
 0x490   :  { %v579_v1 = vmul.f32 %v1444_v25, %v1712_v59 }
 0x491   :  { %636 = vrot.lane.b32.xlu1 %v1439_v23, %s1318_s19 }
 0x495   :  { %638 = vrot.lane.b32.xlu1 %v1435_v21, %s1318_s19 }
 0x4f4   :  { %v1714_v35 = vpop.permute.xlu0 %587 }
 0x4f5   :  { %v591_v38 = vmul.f32 %v1453_v29, %v1714_v35 }
 0x4f7   :  { %v593_v52 = vadd.f32 %v591_v38, %v579_v1 }
 0x4f8   :  { %v1720_v39 = vpop.permute.xlu1 %601 }
 0x4f9   :  { %v605_v40 = vmul.f32 %v1457_v33, %v1720_v39 }
 0x4fa   :  { %v1724_v44 = vpop.permute.xlu0 %610 }
 0x4fb   :  { %v607_v41 = vadd.f32 %v605_v40, %v593_v52  ;;  %v618_v0 = vmul.f32 %v1724_v44, %v1441_v24 }
 0x4fd   :  { %v1726_v45 = vpop.permute.xlu1 %615 }
 0x4fe   :  { %v619_v47 = vmul.f32 %v1437_v22, %v1726_v45 }
 0x500   :  { %v621_v48 = vadd.f32 %v619_v47, %v607_v41  ;;  %v1730_v50 = vpop.permute.xlu0 %629 }
 0x501   :  { %v633_v25 = vmul.f32 %v1446_v26, %v1730_v50 }
 0x502   :  { %v1734_v29 = vpop.permute.xlu1 %582 }
 0x503   :  { %v590_v33 = vmul.f32 %v1734_v29, %v1455_v31  ;;  %v635_v14 = vadd.f32 %v633_v25, %v621_v48 }
 0x505   :  { %v592_v20 = vadd.f32 %v590_v33, %v578_v62 }
 0x507   :  { %v1740_v51 = vpop.permute.xlu1 %596 }
 0x508   :  { %v604_v22 = vmul.f32 %v1740_v51, %v1459_v34 }
 0x50a   :  { %v606_v17 = vadd.f32 %v604_v22, %v592_v20 }
 0x50c   :  { %v1746_v26 = vpop.permute.xlu1 %624  ;;  %v620_v30 = vadd.f32 %v618_v0, %v606_v17  ;;  %v858_v17 = vld [vmem:[%s1935_s3 + $0x1] sm:$0x3f] }
 0x50d   :  { %v632_v27 = vmul.f32 %v1746_v26, %v1450_v28 }
 0x50f   :  { %v634_v53 = vadd.f32 %v632_v27, %v620_v30  ;;  %v861_v30 = vsel %vm860_vm9, %v858_v17, -inf  ;;  %v859_v27 = vld [vmem:[%s1935_s3 + $0x9] sm:$0x3f]  ;;  %s1323_s3 = smov 12  }
 0x510   :  { %v637_v54 = vpop.permute.xlu1 %636 }
 0x511   :  { %v642_v31 = vmul.f32 %v637_v54, %v634_v53  ;;  %v864_v53 = vsel %vm860_vm9, %v859_v27, -inf  ;;  %v1322_v54 = vmov 0  }
 0x512   :  { %1207 = vset.pattern.permute.xlu0 %v1322_v54  ;;  %1208 = vset.pattern.permute.xlu1 %v1322_v54 }
 0x513   :  { %646 = vrot.lane.b32.xlu0 %v642_v31, %s1302_s0 }
 0x514   :  { %v639_v43 = vpop.permute.xlu1 %638 }
 0x515   :  { %v643_v46 = vmul.f32 %v639_v43, %v635_v14 }
 0x517   :  { %648 = vrot.lane.b32.xlu1 %v643_v46, %s1302_s0 }
 0x585   :  { %v647_v34 = vpop.permute.xlu0 %646 }
 0x586   :  { %v652_v58 = vsel %vm241_vm2, %v647_v34, 0.0 }
 0x587   :  { %653 = vadd.xlane.f32.xlu0 %v652_v58 }
 0x589   :  { %v649_v24 = vpop.permute.xlu1 %648 }
 0x58a   :  { %v655_v19 = vsel %vm241_vm2, %v649_v24, 0.0 }
 0x58b   :  { %656 = vadd.xlane.f32.xlu1 %v655_v19 }
 0x59c   :  { %562 = vrot.lane.b32.xlu1 %v1661_v13, %s1312_s18 }
 0x59d   :  { %560 = vrot.lane.b32.xlu0 %v1657_v55, %s1312_s18 }
 0x5a0   :  { %712 = vrot.lane.b32.xlu1 %v1686_v18, %s1319_s20 }
 0x5a1   :  { %710 = vrot.lane.b32.xlu0 %v534_v42, %s1319_s20 }
 0x5a4   :  { %742 = vrot.lane.b32.xlu1 %v1690_v36, %s1319_s20 }
 0x5a5   :  { %740 = vrot.lane.b32.xlu0 %v542_v5, %s1319_s20 }
 0x5a8   :  { %772 = vrot.lane.b32.xlu1 %v1697_v11, %s1319_s20 }
 0x5a9   :  { %770 = vrot.lane.b32.xlu0 %v1693_v49, %s1319_s20 }
 0x5ac   :  { %802 = vrot.lane.b32.xlu1 %v1702_v3, %s1319_s20 }
 0x5ad   :  { %800 = vrot.lane.b32.xlu0 %v558_v32, %s1319_s20 }
 0x614   :  { %v654_v28 = vpop.xlane.xlu0 %653 }
 0x615   :  { %v658_v55 = vadd.f32 %v654_v28, %v1439_v23 }
 0x617   :  { %v1088_v13 = vmul.f32 -1.442695, %v658_v55 }
 0x618   :  { %v657_v60 = vpop.xlane.xlu1 %656  ;;  %v561_v18 = vpop.permute.xlu0 %560 }
 0x619   :  { %1253 = vpow2.f32 %v1088_v13  ;;  %v659_v37 = vadd.f32 %v1435_v21, %v657_v60  ;;  %v1774_v63 = vmul.f32 %v1643_v7, %v561_v18 }
 0x61b   :  { %v1089_v36 = vmul.f32 -1.442695, %v659_v37  ;;  %840 = vrot.lane.b32.xlu0 %v1774_v63, %s1319_s20 }
 0x61c   :  { %v563_v2 = vpop.permute.xlu1 %562  ;;  %v711_v7 = vpop.permute.xlu0 %710 }
 0x61d   :  { %1255 = vpow2.f32 %v1089_v36  ;;  %v1779_v49 = vmul.f32 %v1647_v8, %v563_v2  ;;  %v716_v8 = vsel %vm686_vm5, %v711_v7, 0.0 }
 0x61f   :  { %842 = vrot.lane.b32.xlu1 %v1779_v49, %s1319_s20 }
 0x620   :  { %v713_v61 = vpop.permute.xlu1 %712  ;;  %v741_v15 = vpop.permute.xlu0 %740 }
 0x621   :  { %v717_v16 = vsel %vm687_vm6, %v713_v61, 0.0  ;;  %v746_v32 = vsel %vm686_vm5, %v741_v15, 0.0 }
 0x623   :  { %v1254_v23 = vpop.eup %1253 }
 0x624   :  { %v666_v4 = vadd.f32 1.0, %v1254_v23  ;;  %v743_v42 = vpop.permute.xlu1 %742  ;;  %v771_v5 = vpop.permute.xlu0 %770 }
 0x625   :  { %v747_v1 = vsel %vm687_vm6, %v743_v42, 0.0 }
 0x626   :  { %1257 = vrcp.f32 %v666_v4 }
 0x627   :  { %v1256_v10 = vpop.eup %1255 }
 0x628   :  { %v667_v21 = vadd.f32 1.0, %v1256_v10  ;;  %v801_v38 = vpop.permute.xlu0 %800 }
 0x629   :  { %v806_v40 = vsel %vm686_vm5, %v801_v38, 0.0 }
 0x62a   :  { %1259 = vrcp.f32 %v667_v21 }
 0x630   :  { %v1258_v11 = vpop.eup %1257 }
 0x631   :  { %887 = vrot.lane.b32.xlu0 %v1258_v11, %s1320_s21 }
 0x634   :  { %v1260_v3 = vpop.eup %1259 }
 0x635   :  { %889 = vrot.lane.b32.xlu1 %v1260_v3, %s1320_s21  ;;  %688 = vrot.lane.b32.xlu0 %v1678_v56, %s1319_s20  ;;  %v773_v56 = vpop.permute.xlu1 %772 }
 0x636   :  { %v777_v52 = vsel %vm687_vm6, %v773_v56, 0.0 }
 0x639   :  { %690 = vrot.lane.b32.xlu1 %v1682_v57, %s1319_s20  ;;  %720 = vrot.lane.b32.xlu0 %v716_v8, %s1303_s10  ;;  %v776_v57 = vsel %vm686_vm5, %v771_v5, 0.0  ;;  %v803_v41 = vpop.permute.xlu1 %802 }
 0x63a   :  { %v807_v47 = vsel %vm687_vm6, %v803_v41, 0.0 }
 0x63d   :  { %722 = vrot.lane.b32.xlu1 %v717_v16, %s1303_s10  ;;  %750 = vrot.lane.b32.xlu0 %v746_v32, %s1305_s12 }
 0x641   :  { %752 = vrot.lane.b32.xlu1 %v747_v1, %s1305_s12  ;;  %780 = vrot.lane.b32.xlu0 %v776_v57, %s1304_s11 }
 0x645   :  { %782 = vrot.lane.b32.xlu1 %v777_v52, %s1304_s11  ;;  %810 = vrot.lane.b32.xlu0 %v806_v40, %s1306_s1  ;;  %s1333_s11 = smov [#allocation2]  }
 0x646   :  { %s1063_s12 = sshll.u32 %s1333_s11, 4  ;;  %s1064_s12 = int_to_ptr.vmem [resolvable:$true] %s1063_s12 }
 0x647   :  { %s1277_s14 = scalar_lea.vmem %s1064_s12, 16  ;;  %s1281_s15 = scalar_lea.vmem %s1064_s12, 32 }
 0x648   :  { %p1278_p0 = scmp.ne.s32.totalorder %s1064_s12, %s1277_s14  ;;  %p1282_p1 = scmp.lt.s32.totalorder %s1064_s12, %s1064_s12 }
 0x649   :  { %812 = vrot.lane.b32.xlu1 %v807_v47, %s1306_s1  ;;  %p1283_p2 = scmp.lt.s32.totalorder %s1281_s15, %s1277_s14 }
 0x64b   :  { %p1284_p3 = por %p1283_p2, %p1282_p1 }
 0x64d   :  { %p1285_p4 = pnand %p1284_p3, %p1278_p0 }
 0x68d   :  { %v841_v48 = vpop.permute.xlu0 %840 }
 0x68e   :  { %v846_v25 = vsel %vm686_vm5, %v841_v48, 0.0 }
 0x68f   :  { %850 = vrot.lane.b32.xlu0 %v846_v25, %s1307_s13  ;;  %v1324_v25 = vmov 4  }
 0x691   :  { %v843_v62 = vpop.permute.xlu1 %842 }
 0x692   :  { %v847_v33 = vsel %vm687_vm6, %v843_v62, 0.0  ;;  %v1325_v62 = vmov 1  }
 0x693   :  { %852 = vrot.lane.b32.xlu1 %v847_v33, %s1307_s13  ;;  %v1326_v33 = vmov 5  }
 0x6a3   :  { %v888_v14 = vpop.permute.xlu0 %887 }
 0x6a4   :  { %v1820_v20 = vsel %vm883_vm7, 0.0, %v888_v14  ;;  %v1327_v14 = vmov 11  }
 0x6a5   :  { %909 = vrot.lane.b32.xlu0 %v1820_v20, %s1321_s22 }
 0x6a7   :  { %v890_v22 = vpop.permute.xlu1 %889  ;;  %v689_v31 = vpop.permute.xlu0 %688 }
 0x6a8   :  { %v1825_v0 = vsel %vm884_vm8, 0.0, %v890_v22  ;;  %v694_v28 = vsel %vm686_vm5, %v689_v31, 0.0  ;;  %v1328_v22 = vmov 2   ;;  %v907_v31 = vsub.f32 1.0, %v1820_v20 }
 0x6a9   :  { %911 = vrot.lane.b32.xlu1 %v1825_v0, %s1321_s22 }
 0x6ab   :  { %v691_v43 = vpop.permute.xlu1 %690  ;;  %v721_v46 = vpop.permute.xlu0 %720 }
 0x6ac   :  { %v726_v13 = vadd.f32 %v721_v46, %v694_v28  ;;  %v695_v37 = vsel %vm687_vm6, %v691_v43, 0.0  ;;  %vm949_vm6 = vcmask 391169  }
 0x6af   :  { %v723_v34 = vpop.permute.xlu1 %722  ;;  %v751_v58 = vpop.permute.xlu0 %750 }
 0x6b0   :  { %v756_v18 = vadd.f32 %v751_v58, %v726_v13  ;;  %v727_v36 = vadd.f32 %v723_v34, %v695_v37  ;;  %v672_v13 = vlaneseq }
 0x6b3   :  { %v753_v24 = vpop.permute.xlu1 %752  ;;  %v781_v19 = vpop.permute.xlu0 %780 }
 0x6b4   :  { %v786_v2 = vadd.f32 %v781_v19, %v756_v18  ;;  %v757_v10 = vadd.f32 %v753_v24, %v727_v36  ;;  %v1869_v18 = vand.u32 127, %v672_v13 }
 0x6b7   :  { %v783_v55 = vpop.permute.xlu1 %782  ;;  %v811_v60 = vpop.permute.xlu0 %810 }
 0x6b8   :  { %v816_v21 = vadd.f32 %v811_v60, %v786_v2  ;;  %v787_v7 = vadd.f32 %v783_v55, %v757_v10 }
 0x6bb   :  { %v813_v23 = vpop.permute.xlu1 %812 }
 0x6bc   :  { %v817_v15 = vadd.f32 %v813_v23, %v787_v7 }
 0x6c4   :  { %862 = vmax.xlane.f32.xlu0 %v861_v30  ;;  %v1330_v30 = vmov 3  }
 0x6cd   :  { %865 = vmax.xlane.f32.xlu1 %v864_v53 }
 0x701   :  { %v851_v4 = vpop.permute.xlu0 %850 }
 0x702   :  { %v856_v11 = vadd.f32 %v851_v4, %v816_v21 }
 0x705   :  { %v853_v61 = vpop.permute.xlu1 %852 }
 0x706   :  { %v857_v42 = vadd.f32 %v853_v61, %v817_v15 }
 0x717   :  { %v910_v3 = vpop.permute.xlu0 %909 }
 0x718   :  { %v915_v8 = vmul.f32 %v910_v3, %v856_v11 }
 0x71a   :  { %919 = vrot.lane.b32.xlu0 %v915_v8, %s1323_s3 }
 0x71b   :  { %v912_v5 = vpop.permute.xlu1 %911 }
 0x71c   :  { %v916_v16 = vmul.f32 %v912_v5, %v857_v42 }
 0x71e   :  { %921 = vrot.lane.b32.xlu1 %v916_v16, %s1323_s3 }
 0x751   :  { %v863_v32 = vpop.xlane.xlu0 %862 }
 0x752   :  { %v867_v56 = vsub.f32 %v858_v17, %v863_v32  ;;  %v1329_v17 = vmov 12  }
 0x754   :  { %v869_v1 = vmul.f32 1.442695, %v867_v56 }
 0x756   :  { %1261 = vpow2.f32 %v869_v1 }
 0x75a   :  { %v866_v57 = vpop.xlane.xlu1 %865 }
 0x75b   :  { %v868_v38 = vsub.f32 %v859_v27, %v866_v57  ;;  %v908_v27 = vsub.f32 1.0, %v1825_v0 }
 0x75d   :  { %v871_v52 = vmul.f32 1.442695, %v868_v38 }
 0x75f   :  { %1263 = vpow2.f32 %v871_v52 }
 0x760   :  { %v1841_v40 = vpop.eup %1261 }
 0x761   :  { %v873_v41 = vsel %vm860_vm9, %v1841_v40, 0.0 }
 0x762   :  { %874 = vadd.xlane.f32.xlu0 %v873_v41 }
 0x769   :  { %v1845_v47 = vpop.eup %1263 }
 0x76a   :  { %v876_v48 = vsel %vm860_vm9, %v1845_v47, 0.0 }
 0x76b   :  { %877 = vadd.xlane.f32.xlu1 %v876_v48 }
 0x778   :  { %675 = vperm.xlu0 %1207, %v1504_v12  }
 0x77c   :  { %678 = vperm.xlu1 %1208, %v1498_v9   ;;  %1212 = vset.pattern.permute.xlu0 %v1324_v25 }
 0x77d   :  { %789 = vperm.xlu0 %1212, %v1504_v12  }
 0x780   :  { %1209 = vset.pattern.permute.xlu1 %v1325_v62 }
 0x781   :  { %699 = vperm.xlu1 %1209, %v1504_v12   ;;  %1215 = vset.pattern.permute.xlu0 %v1326_v33 }
 0x782   :  { %822 = vperm.xlu0 %1215, %v1498_v9  }
 0x785   :  { %702 = vperm.xlu1 %1209, %v1498_v9  }
 0x786   :  { %1216 = vset.pattern.permute.xlu0 %v1327_v14 }
 0x787   :  { %828 = vperm.xlu0 %1216, %v1774_v63  }
 0x789   :  { %1210 = vset.pattern.permute.xlu1 %v1328_v22 }
 0x78a   :  { %729 = vperm.xlu1 %1210, %v1504_v12  }
 0x78b   :  { %1219 = vset.pattern.permute.xlu0 %v1329_v17 }
 0x78c   :  { %902 = vperm.xlu0 %1219, %v1825_v0   ;;  %v920_v54 = vpop.permute.xlu0 %919 }
 0x78d   :  { %v925_v43 = vadd.f32 %v920_v54, %v907_v31  ;;  %v1331_v31 = vmov 0.0  }
 0x78e   :  { %732 = vperm.xlu1 %1210, %v1498_v9  }
 0x790   :  { %v922_v63 = vpop.permute.xlu1 %921 }
 0x791   :  { %v926_v53 = vadd.f32 %v922_v63, %v908_v27 }
 0x792   :  { %1211 = vset.pattern.permute.xlu1 %v1330_v30 }
 0x793   :  { %759 = vperm.xlu1 %1211, %v1504_v12  }
 0x797   :  { %762 = vperm.xlu1 %1211, %v1498_v9  }
 0x79b   :  { %1213 = vset.pattern.permute.xlu1 %v1324_v25 }
 0x79c   :  { %792 = vperm.xlu1 %1213, %v1498_v9  }
 0x7a0   :  { %1214 = vset.pattern.permute.xlu1 %v1326_v33 }
 0x7a1   :  { %819 = vperm.xlu1 %1214, %v1504_v12  }
 0x7a5   :  { %1217 = vset.pattern.permute.xlu1 %v1327_v14 }
 0x7a6   :  { %833 = vperm.xlu1 %1217, %v1779_v49  }
 0x7aa   :  { %1218 = vset.pattern.permute.xlu1 %v1329_v17 }
 0x7ab   :  { %933 = vperm.xlu1 %1218, %v926_v53  }
 0x7af   :  { %929 = vperm.xlu1 %1218, %v925_v43  }
 0x7b3   :  { %897 = vperm.xlu1 %1218, %v1820_v20  }
 0x7b7   :  { %953 = vperm.xlu1 %1218, %v1504_v12  }
 0x7bb   :  { %956 = vperm.xlu1 %1218, %v1498_v9  }
 0x7ef   :  { %v875_v28 = vpop.xlane.xlu0 %874 }
 0x7f7   :  { %v676_v60 = vpop.permute.xlu0 %675 }
 0x7f8   :  { %v878_v46 = vpop.xlane.xlu1 %877  ;;  %vm680_vm15 = vcmp.eq.s32.totalorder %v1869_v18, %v676_v60 }
 0x7f9   :  { %1265 = vrcp.f32 %v878_v46  ;;  %v682_v7 = vsel %vm680_vm15, %v1710_v6, 0.0 }
 0x7fa   :  { %1267 = vrcp.f32 %v875_v28 }
 0x7fc   :  { %v679_v34 = vpop.permute.xlu1 %678  ;;  %v790_v12 = vpop.permute.xlu0 %789 }
 0x7fd   :  { %vm681_vm11 = vcmp.eq.s32.totalorder %v1869_v18, %v679_v34  ;;  %vm794_vm4 = vcmp.eq.s32.totalorder %v1869_v18, %v790_v12 }
 0x7fe   :  { %v683_v36 = vsel %vm681_vm11, %v1712_v59, 0.0  ;;  %v796_v57 = vsel %vm794_vm4, %v1746_v26, 0.0 }
 0x800   :  { %v700_v58 = vpop.permute.xlu1 %699 }
 0x801   :  { %vm704_vm13 = vcmp.eq.s32.totalorder %v1869_v18, %v700_v58  ;;  %v823_v2 = vpop.permute.xlu0 %822 }
 0x802   :  { %vm825_vm2 = vcmp.eq.s32.totalorder %v1869_v18, %v823_v2 }
 0x803   :  { %v1266_v61 = vpop.eup %1265 }
 0x804   :  { %v703_v49 = vpop.permute.xlu1 %702  ;;  %v882_v16 = vmul.f32 %v1266_v61, %v1845_v47  ;;  %v1268_v56 = vpop.eup %1267 }
 0x805   :  { %vm705_vm10 = vcmp.eq.s32.totalorder %v1869_v18, %v703_v49  ;;  %v881_v41 = vmul.f32 %v1268_v56, %v1841_v40 }
 0x806   :  { %v707_v9 = vsel %vm705_vm10, %v1714_v35, 0.0  ;;  %v706_v35 = vsel %vm704_vm13, %v1734_v29, 0.0  ;;  %v829_v8 = vpop.permute.xlu0 %828  ;;  %vm1012_vm13 = vcmask 5120  }
 0x807   :  { %v709_v4 = vadd.f32 %v707_v9, %v683_v36  ;;  %v708_v3 = vadd.f32 %v706_v35, %v682_v7 }
 0x809   :  { %v730_v24 = vpop.permute.xlu1 %729 }
 0x80a   :  { %vm734_vm0 = vcmp.eq.s32.totalorder %v1869_v18, %v730_v24 }
 0x80b   :  { %v903_v38 = vpop.permute.xlu0 %902 }
 0x80d   :  { %v733_v0 = vpop.permute.xlu1 %732 }
 0x80e   :  { %vm735_vm12 = vcmp.eq.s32.totalorder %v1869_v18, %v733_v0 }
 0x80f   :  { %v737_v23 = vsel %vm735_vm12, %v1720_v39, 0.0  ;;  %v736_v39 = vsel %vm734_vm0, %v1740_v51, 0.0 }
 0x810   :  { %v739_v21 = vadd.f32 %v737_v23, %v709_v4  ;;  %v1276_v23 = vld [vmem:[%s1934_s2] sm:$0xff] }
 0x811   :  { %vm986_vm11 = vcmp.eq.s32.totalorder %v1276_v23, 4294967196 }
 0x812   :  { %v760_v19 = vpop.permute.xlu1 %759 }
 0x813   :  { %vm764_vm3 = vcmp.eq.s32.totalorder %v1869_v18, %v760_v19 }
 0x814   :  { %v766_v29 = vsel %vm764_vm3, %v1724_v44, 0.0 }
 0x816   :  { %v763_v55 = vpop.permute.xlu1 %762 }
 0x817   :  { %vm765_vm14 = vcmp.eq.s32.totalorder %v1869_v18, %v763_v55 }
 0x818   :  { %v767_v10 = vsel %vm765_vm14, %v1726_v45, 0.0  ;;  %v738_v45 = vadd.f32 %v736_v39, %v708_v3  ;;  %vm1053_vm14 = vcmask 0  }
 0x819   :  { %v769_v15 = vadd.f32 %v767_v10, %v739_v21 }
 0x81a   :  { %v768_v6 = vadd.f32 %v766_v29, %v738_v45 }
 0x81b   :  { %v793_v37 = vpop.permute.xlu1 %792 }
 0x81c   :  { %vm795_vm1 = vcmp.eq.s32.totalorder %v1869_v18, %v793_v37  ;;  %v798_v33 = vadd.f32 %v796_v57, %v768_v6 }
 0x81d   :  { %v797_v11 = vsel %vm795_vm1, %v1730_v50, 0.0 }
 0x81e   :  { %v799_v5 = vadd.f32 %v797_v11, %v769_v15 }
 0x820   :  { %v820_v20 = vpop.permute.xlu1 %819 }
 0x821   :  { %vm824_vm5 = vcmp.eq.s32.totalorder %v1869_v18, %v820_v20 }
 0x822   :  { %v836_v52 = vsel %vm824_vm5, %v829_v8, 0.0 }
 0x823   :  { %v838_v22 = vadd.f32 %v836_v52, %v798_v33 }
 0x825   :  { %v834_v59 = vpop.permute.xlu1 %833 }
 0x826   :  { %v837_v42 = vsel %vm825_vm2, %v834_v59, 0.0 }
 0x827   :  { %v839_v51 = vadd.f32 %v837_v42, %v799_v5 }
 0x829   :  { %v906_v48 = vmul.f32 %v903_v38, %v839_v51 }
 0x82a   :  { %v934_v32 = vpop.permute.xlu1 %933 }
 0x82b   :  { %v936_v50 = vrot.slane %v934_v32, 1 }
 0x82d   :  { %v940_v1 = vmul.f32 %v936_v50, %v882_v16 }
 0x82e   :  { %v930_v44 = vpop.permute.xlu1 %929 }
 0x82f   :  { %v944_v25 = vrot.slane %v940_v1, 7  ;;  %v935_v62 = vrot.slane %v930_v44, 1 }
 0x831   :  { %v948_v47 = vadd.f32 %v944_v25, %v906_v48  ;;  %v939_v14 = vmul.f32 %v935_v62, %v881_v41 }
 0x832   :  { %v898_v17 = vpop.permute.xlu1 %897 }
 0x833   :  { %v965_v30 = vadd.f32 1e-09, %v948_v47  ;;  %v943_v63 = vrot.slane %v939_v14, 7  ;;  %v905_v27 = vmul.f32 %v898_v17, %v838_v22  ;;  %951 = vst.msk [vmem:[%s1936_s4 + $0x7] sm:$0x7e] %vm949_vm6, %v948_v47 }
 0x835   :  { %1269 = vlog2.f32 %v965_v30  ;;  %v947_v26 = vadd.f32 %v943_v63, %v905_v27 }
 0x836   :  { %v954_v40 = vpop.permute.xlu1 %953 }
 0x837   :  { %950 = vst.msk [vmem:[%s1936_s4 - $0x1] sm:$0x7e] %vm949_vm6, %v947_v26  ;;  %v964_v53 = vadd.f32 1e-09, %v947_v26  ;;  %vm958_vm8 = vcmp.eq.s32.totalorder %v1869_v18, %v954_v40 }
 0x838   :  { %v1090_v49 = vsel %vm958_vm8, 1.0, %v1331_v31 }
 0x839   :  { %1271 = vlog2.f32 %v964_v53  ;;  %v972_v19 = vrot.slane %v1090_v49, 1 }
 0x83a   :  { %v957_v54 = vpop.permute.xlu1 %956 }
 0x83b   :  { %vm959_vm7 = vcmp.eq.s32.totalorder %v1869_v18, %v957_v54  ;;  %v1275_v18 = vld [vmem:[%s1934_s2 + $0x8] sm:$0xff] }
 0x83c   :  { %v1091_v43 = vsel %vm959_vm7, 1.0, %v1331_v31  ;;  %vm987_vm9 = vcmp.eq.s32.totalorder %v1275_v18, 4294967196 }
 0x83d   :  { %v973_v34 = vrot.slane %v1091_v43, 1 }
 0x83f   :  { %v1270_v46 = vpop.eup %1269 }
 0x840   :  { %v969_v58 = vmul.f32 0.6931472, %v1270_v46 }
 0x842   :  { %v977_v24 = vmul.f32 %v973_v34, %v969_v58 }
 0x843   :  { %v1272_v0 = vpop.eup %1271 }
 0x844   :  { %v981_v28 = vsel %vm949_vm6, %v977_v24, 0.0  ;;  %v967_v55 = vmul.f32 0.6931472, %v1272_v0 }
 0x845   :  { %982 = vadd.xlane.f32.xlu1 %v981_v28 }
 0x846   :  { %v976_v13 = vmul.f32 %v972_v19, %v967_v55 }
 0x848   :  { %v978_v60 = vsel %vm949_vm6, %v976_v13, 0.0 }
 0x849   :  { %979 = vadd.xlane.f32.xlu0 %v978_v60 }
 0x8d2   :  { %v983_v37 = vpop.xlane.xlu1 %982 }
 0x8d3   :  { %v985_v12 = vsub.f32 0.0, %v983_v37 }
 0x8d5   :  { %v991_v9 = vrot.slane %v985_v12, 7 }
 0x8d6   :  { %v980_v20 = vpop.xlane.xlu0 %979 }
 0x8d7   :  { %v995_v36 = vsel %vm987_vm9, 0.0, %v991_v9  ;;  %v984_v2 = vsub.f32 0.0, %v980_v20 }
 0x8d8   :  { %vm997_vm10 = vcmp.ne.f32.partialorder %v995_v36, 0.0  ;;  %v1029_v11 = vrot.slane %v995_v36, 2 }
 0x8d9   :  { %v990_v4 = vrot.slane %v984_v2, 7  ;;  %v1093_v35 = vsel %vm997_vm10, 1.0, %v1331_v31 }
 0x8da   :  { %v1005_v59 = vrot.slane %v1093_v35, 2 }
 0x8db   :  { %v994_v10 = vsel %vm986_vm11, 0.0, %v990_v4 }
 0x8dc   :  { %vm996_vm12 = vcmp.ne.f32.partialorder %v994_v10, 0.0  ;;  %v1028_v45 = vrot.slane %v994_v10, 2 }
 0x8dd   :  { %v1092_v21 = vsel %vm996_vm12, 1.0, %v1331_v31 }
 0x8de   :  { %v1004_v7 = vrot.slane %v1092_v21, 2 }
 0x8e0   :  { %v1220_v39 = vpack.i.bf16 %v1005_v59, %v1004_v7 }
 0x8e2   :  { %1221 = vrot.lane.b32.xlu0 %v1220_v39, %s1321_s22 }
 0x8e6   :  { %1032 = vrot.lane.b32.xlu0 %v1029_v11, %s1321_s22 }
 0x954   :  { %v1222_v61 = vpop.permute.xlu0 %1221 }
 0x955   :  { %v1224_v3 = vunpack.i.h.bf16 %v1222_v61  ;;  %v1223_v15 = vunpack.i.l.bf16 %v1222_v61 }
 0x957   :  { %v1014_v8 = vsel %vm1012_vm13, %v1224_v3, 0.0  ;;  %v1013_v29 = vsel %vm1012_vm13, %v1223_v15, 0.0 }
 0x958   :  { %v1015_v42 = vadd.f32 %v1014_v8, %v1013_v29  ;;  %v1033_v32 = vpop.permute.xlu0 %1032 }
 0x959   :  { %v1037_v51 = vsel %vm1012_vm13, %v1033_v32, 0.0 }
 0x95a   :  { %1016 = vadd.xlane.f32.xlu1 %v1015_v42 }
 0x96b   :  { %1030 = vrot.lane.b32.xlu1 %v1028_v45, %s1321_s22 }
 0x9e7   :  { %v1017_v5 = vpop.xlane.xlu1 %1016 }
 0x9e8   :  { %v1018_v16 = vrot.slane %v1017_v5, 4 }
 0x9ea   :  { %v1019_v56 = vadd.f32 %v1018_v16, %v1017_v5 }
 0x9eb   :  { %v1031_v6 = vpop.permute.xlu1 %1030 }
 0x9ec   :  { %v1020_v50 = vrot.slane %v1019_v56, 2  ;;  %v1036_v1 = vsel %vm1012_vm13, %v1031_v6, 0.0 }
 0x9ed   :  { %v1038_v57 = vadd.f32 %v1037_v51, %v1036_v1 }
 0x9ee   :  { %v1021_v38 = vadd.f32 %v1020_v50, %v1019_v56 }
 0x9ef   :  { %1039 = vadd.xlane.f32.xlu0 %v1038_v57 }
 0x9f0   :  { %v1022_v52 = vrot.slane %v1021_v38, 1 }
 0x9f2   :  { %v1023_v44 = vadd.f32 %v1022_v52, %v1021_v38 }
 0x9f4   :  { %1158 = vpush %v1023_v44 }
 0xa25   :  { %s1159_s2 = spop %1158 }
 0xa26   :  { %s1025_s9 = smax.f32 %s1332_s8, %s1159_s2 }
 0xa27   :  { %v1048_v41 = vstv %s1025_s9 }
 0xa28   :  { %1273 = vrcp.f32 %v1048_v41 }
 0xa32   :  { %v1274_v17 = vpop.eup %1273 }
 0xa7c   :  { %v1040_v48 = vpop.xlane.xlu0 %1039 }
 0xa7d   :  { %v1041_v25 = vrot.slane %v1040_v48, 4 }
 0xa7f   :  { %v1042_v62 = vadd.f32 %v1041_v25, %v1040_v48 }
 0xa81   :  { %v1043_v33 = vrot.slane %v1042_v62, 2 }
 0xa83   :  { %v1044_v47 = vadd.f32 %v1043_v33, %v1042_v62 }
 0xa85   :  { %v1045_v14 = vrot.slane %v1044_v47, 1 }
 0xa87   :  { %v1046_v22 = vadd.f32 %v1045_v14, %v1044_v47 }
 0xa89   :  { %1160 = vpush %v1046_v22 }
 0xa8a   :  { %1162 = vpush %v1274_v17 }
 0xaba   :  { %s1161_s10 = spop %1160 }
 0xabb   :  { %s1163_s1 = spop %1162 }
 0xabc   :  { %s1051_s13 = smul.f32 %s1163_s1, %s1161_s10 }
 0xabe   :  { %v1052_v30 = vstv %s1051_s13 }
 0xabf   :  { %1054 = vst.msk [vmem:[#allocation2] sm:$0x1] %vm1053_vm14, %v1052_v30 }
 0xac0   :  { %1288 = shalt.err (!%p1285_p4)
}
 0xac1   :  { %s1289_s18 = scalar_lea.hbm %s1937_s5, 16 }
 0xac2   :  { %p1290_p5 = scmp.ne.s32.totalorder %s1937_s5, %s1289_s18  ;;  %p1293_p6 = scmp.lt.u32.totalorder %s1289_s18, %s1937_s5 }
 0xac4   :  { %p1295_p7 = pnand %p1293_p6, %p1290_p5 }
 0xac6   :  { %1298 = shalt.err (!%p1295_p7)
}
 0xac7   :  { %1066 = dma.vmem_to_hbm [thread:$0]  %s1064_s12, 16, %s1937_s5, [#allocation3]  }
 0xac8   :  { %1299 = dma.done.wait [#allocation3], 16  }
 0xac9   :  { %1300 = vsyncadd [#allocation3], 4294967280 }
 0xaca   :  { %1072 = vsyncpa [#allocation3], 1 }

</bundles_post_ra>
